<compile_context>
chip_gen: v5e
topology: v5e:2x2
jax: 0.10.0
libtpu: 0.0.40
codegen_flags: <defaults>
</compile_context>

<pallas_src>
import math
import functools

import jax
import jax.numpy as jnp
import numpy as np
from jax.experimental import pallas as pl
from jax.experimental.pallas import tpu as pltpu


def _mhsa_kernel(heads_per_block, head_dims, batch_block,
                 x_ref,            # (Bt, S, D) input block (q == k == v)
                 lens_ref,         # (Bt, 1, 1) int32 valid key lengths
                 wqkv_ref,         # (1, D, 3*Kg) fused Q|K|V weights of this head group
                 bqkv_ref,         # (1, 1, 3*Kg)
                 wo_ref,           # (1, Kg, D)   output-projection rows of this head group
                 bo_ref,           # (1, D)
                 out_ref,          # (Bt, S, D)
                 attn_ref,         # (Bt, Ht, S, S)
                 acc_ref):         # VMEM scratch (Bt*S, D) f32 output accumulator
    Ht, hd, Bt = heads_per_block, head_dims, batch_block
    _, S, D = x_ref.shape
    Kg = Ht * hd
    hg = pl.program_id(1)
    last_hg = pl.num_programs(1) - 1

    @pl.when(hg == 0)
    def _():
        acc_ref[...] = jnp.zeros_like(acc_ref)

    x = x_ref[...]                           # keep native (bf16-friendly) dtype for the MXU
    cdt = x.dtype

    # Fused Q|K|V projection for this head group: one (Bt*S, D) @ (D, 3*Kg)
    # matmul, f32 accumulation. The softmax scale is folded into the Q columns.
    proj = jnp.dot(x.reshape(Bt * S, D), wqkv_ref[0],
                   preferred_element_type=jnp.float32) + bqkv_ref[0]
    proj = proj.astype(cdt)
    qg = proj[:, 0 * Kg:1 * Kg].reshape(Bt, S, Kg)
    kg = proj[:, 1 * Kg:2 * Kg].reshape(Bt, S, Kg)
    vg = proj[:, 2 * Kg:3 * Kg].reshape(Bt, S, Kg)

    # Key-padding mask (True on padded keys): broadcast-compare a key iota
    # against the (Bt,1,1) lengths. Large finite negative instead of -inf so a
    # fully padded row gives uniform weights instead of NaN (inf - inf).
    col_ids = jax.lax.broadcasted_iota(jnp.int32, (Bt, 1, S), 2)
    pad_mask = col_ids >= lens_ref[...]
    neg = jnp.float32(-1e30)

    ctx_parts = []
    for t in range(Ht):                      # static unroll over heads in the group
        lo = t * hd
        qh = qg[:, :, lo:lo + hd]
        kh = kg[:, :, lo:lo + hd]
        vh = vg[:, :, lo:lo + hd]

        # q . k^T via contraction over the last dim — no materialized transpose.
        scores = jnp.einsum("bqd,bkd->bqk", qh, kh,
                            preferred_element_type=jnp.float32)
        scores = jnp.where(pad_mask, neg, scores)

        # Numerically stable, exact softmax (the weights are an API output and
        # must sum to 1; approx reciprocal is not used here).
        m = jnp.max(scores, axis=-1, keepdims=True)
        e = jnp.exp(scores - m)
        p = e / jnp.sum(e, axis=-1, keepdims=True)

        attn_ref[:, t] = p.astype(attn_ref.dtype)        # one full head-slab store

        ctx_parts.append(
            jnp.einsum("bqk,bkd->bqd", p.astype(cdt), vh,
                       preferred_element_type=jnp.float32).astype(cdt))

    # Head-concatenated context -> single wide-K (= Ht*hd) output-projection
    # matmul per head group, accumulated into the persistent f32 scratch.
    ctx = ctx_parts[0] if Ht == 1 else jnp.concatenate(ctx_parts, axis=-1)
    acc_ref[...] += jnp.dot(ctx.reshape(Bt * S, Kg), wo_ref[0],
                            preferred_element_type=jnp.float32)

    @pl.when(hg == last_hg)
    def _():
        out = acc_ref[...] + bo_ref[...]
        out_ref[...] = out.reshape(Bt, S, D).astype(out_ref.dtype)


def _pick_batch_block(B, S_pad, attn_itemsize):
    divisors = [d for d in (8, 4, 2, 1) if B % d == 0]
    # Prefer >= 2 batch grid steps (v7x megacore split + DMA/compute overlap).
    bt = next((d for d in divisors if B // d >= 2), divisors[-1])
    # Keep the (Ht=1) attn block under a modest per-buffer VMEM budget.
    while bt > 1 and bt % 2 == 0 and bt * S_pad * S_pad * attn_itemsize > (8 << 20):
        bt //= 2
    return bt


def _pick_head_block(H, hd, Bt, S_pad, attn_itemsize):
    best = 1
    for cand in range(1, H + 1):
        if H % cand:
            continue
        if cand * hd > 512:                   # no MXU benefit past K ~ 256-512
            continue
        if Bt * cand * S_pad * S_pad * attn_itemsize > (8 << 20):
            continue
        best = cand
    return best


def multihead_self_attention(query, key, value, value_lengths, params, *,
                             num_heads, attn_dtype=jnp.bfloat16,
                             batch_block=None, head_block=None, pad_seq=None):
    assert query.shape == key.shape == value.shape, \
        "Self-attention requires q, k, v to have same shape"
    # This module is used as pure self-attention (query is key is value); we
    # exploit that to fetch the input once and fuse the three projections.
    # TODO(synk): distinct query/key/value tensors would need an unfused projection path.
    x = query
    B, S, D = x.shape
    H = num_heads
    assert D % H == 0, "Input dims is not multiple of number of heads"
    hd = D // H

    # Optional lane-dense attn writeback: pad S to a multiple of 128 (the
    # (B,H,S,S) store dominates HBM traffic). Only worth it when the S^2
    # inflation is modest, so auto-enable for S >= 128 only.
    if pad_seq is None:
        pad_seq = (S % 128 != 0) and (S >= 128)
    S_pad = ((S + 127) // 128) * 128 if (pad_seq and S % 128 != 0) else S
    if S_pad != S:
        x = jnp.pad(x, ((0, 0), (0, S_pad - S), (0, 0)))

    attn_itemsize = np.dtype(attn_dtype).itemsize
    if batch_block is None:
        batch_block = _pick_batch_block(B, S_pad, attn_itemsize)
    assert B % batch_block == 0
    Bt = batch_block

    if head_block is None:
        head_block = _pick_head_block(H, hd, Bt, S_pad, attn_itemsize)
    assert H % head_block == 0
    Ht = head_block
    G = H // Ht
    Kg = Ht * hd

    # ---- host-side (trace-time) weight fusion -------------------------------
    # Weights cast to the activation dtype so bf16 activations hit the bf16 MXU
    # path (and halve weight DMA bytes). 1/sqrt(hd) folded into W_q / b_q.
    w_dtype = x.dtype
    scale = 1.0 / math.sqrt(hd)
    wq = (params["wq"] * scale).astype(w_dtype)
    wk = params["wk"].astype(w_dtype)
    wv = params["wv"].astype(w_dtype)
    bq = (params["bq"] * scale).astype(w_dtype)
    bk = params["bk"].astype(w_dtype)
    bv = params["bv"].astype(w_dtype)

    def group_cols(w):   # (D, D) -> (G, D, Kg): weight columns of head-group g
        return w.reshape(D, G, Kg).transpose(1, 0, 2)

    def group_bias(b):   # (1, D) -> (G, 1, Kg)
        return b.reshape(1, G, Kg).transpose(1, 0, 2)

    wqkv_g = jnp.concatenate([group_cols(wq), group_cols(wk), group_cols(wv)],
                             axis=-1)                       # (G, D, 3*Kg)
    bqkv_g = jnp.concatenate([group_bias(bq), group_bias(bk), group_bias(bv)],
                             axis=-1)                       # (G, 1, 3*Kg)
    wo_g = params["wo"].astype(w_dtype).reshape(G, Kg, D)   # projection rows of group g
    bo = params["bo"].astype(w_dtype)                       # (1, D)

    lens3 = value_lengths.astype(jnp.int32).reshape(B, 1, 1)

    kernel = functools.partial(_mhsa_kernel, Ht, hd, Bt)

    # ---- explicit VMEM budget ------------------------------------------------
    x_bytes = np.dtype(x.dtype).itemsize
    w_bytes = np.dtype(w_dtype).itemsize
    wbuf = 1 if G == 1 else 2            # invariant weights are single-buffered
    footprint = (
        2 * Bt * S_pad * D * x_bytes                       # x input (double-buffered)
        + 2 * Bt * S_pad * D * x_bytes                     # x output
        + 2 * Bt * Ht * S_pad * S_pad * attn_itemsize      # attn output
        + wbuf * (D * 3 * Kg + 3 * Kg) * w_bytes           # wqkv + bqkv
        + wbuf * Kg * D * w_bytes                          # wo
        + D * w_bytes                                      # bo
        + Bt * S_pad * D * 4                               # f32 accumulator scratch
        + 2 * Bt * 4                                       # lengths
    )
    vmem_limit = int(min(128 << 20, max(32 << 20, footprint * 3 // 2 + (4 << 20))))

    grid = (B // Bt, G)

    def build(single_buffer_weights):
        def const_spec(shape, imap, invariant):
            if single_buffer_weights and invariant:
                # Constant-index blocks: no point double-buffering them.
                return pl.BlockSpec(shape, imap, pipeline_mode=pl.Buffered(1))
            return pl.BlockSpec(shape, imap)

        in_specs = [
            pl.BlockSpec((Bt, S_pad, D), lambda b, hg: (b, 0, 0)),          # x
            pl.BlockSpec((Bt, 1, 1), lambda b, hg: (b, 0, 0)),              # lengths
            const_spec((1, D, 3 * Kg), lambda b, hg: (hg, 0, 0), G == 1),   # wqkv
            const_spec((1, 1, 3 * Kg), lambda b, hg: (hg, 0, 0), G == 1),   # bqkv
            const_spec((1, Kg, D), lambda b, hg: (hg, 0, 0), G == 1),       # wo
            const_spec((1, D), lambda b, hg: (0, 0), True),                 # bo
        ]
        out_specs = [
            pl.BlockSpec((Bt, S_pad, D), lambda b, hg: (b, 0, 0)),          # resident over hg
            pl.BlockSpec((Bt, Ht, S_pad, S_pad), lambda b, hg: (b, hg, 0, 0)),
        ]
        grid_spec = pltpu.PrefetchScalarGridSpec(
            num_scalar_prefetch=0,
            grid=grid,
            in_specs=in_specs,
            out_specs=out_specs,
            scratch_shapes=[pltpu.VMEM((Bt * S_pad, D), jnp.float32)],
        )
        return pl.pallas_call(
            kernel,
            grid_spec=grid_spec,
            out_shape=(
                jax.ShapeDtypeStruct((B, S_pad, D), x.dtype),
                jax.ShapeDtypeStruct((B, H, S_pad, S_pad), attn_dtype),
            ),
            compiler_params=pltpu.CompilerParams(
                dimension_semantics=("parallel", "arbitrary"),
                vmem_limit_bytes=vmem_limit),
        )

    args = (x, lens3, wqkv_g, bqkv_g, wo_g, bo)
    try:
        out_x, attn = build(True)(*args)
    except Exception:
        # TODO(synk): fallback if this JAX build rejects single-buffered
        # (pl.Buffered(1)) invariant weight blocks.
        out_x, attn = build(False)(*args)

    if S_pad != S:
        out_x = out_x[:, :S, :]
        attn = attn[:, :, :S, :S]
    return out_x, attn


def _reference(q, k, v, lengths, params, num_heads):
    B, S, D = q.shape
    hd = D // num_heads
    qp = q @ params["wq"] + params["bq"]
    kp = k @ params["wk"] + params["bk"]
    vp = v @ params["wv"] + params["bv"]

    def split(x):
        return x.reshape(B, S, num_heads, hd).transpose(0, 2, 1, 3)

    qh, kh, vh = split(qp), split(kp), split(vp)
    scores = jnp.einsum("bhqd,bhkd->bhqk", qh, kh) / math.sqrt(hd)
    pad = jnp.arange(S)[None, :] >= lengths[:, None]           # (B, S)
    scores = jnp.where(pad[:, None, None, :], -jnp.inf, scores)
    attn = jax.nn.softmax(scores, axis=-1)
    ctx = jnp.einsum("bhqk,bhkd->bhqd", attn, vh)
    ctx = ctx.transpose(0, 2, 1, 3).reshape(B, S, D)
    x = ctx @ params["wo"] + params["bo"]
    return x, attn


if __name__ == "__main__":
    B, S, D, H = 2, 8, 32, 4

    key = jax.random.PRNGKey(0)
    keys = jax.random.split(key, 12)

    # q == k == v (self-attention on the same sequence), as in module usage.
    x_in = jax.random.normal(keys[0], (B, S, D), jnp.float32)
    q = k = v = x_in
    value_lengths = jnp.array([S, 5], dtype=jnp.int32)

    # Deterministic parameter init (Linear: weight stored as [in, out]).
    bound = 1.0 / math.sqrt(D)

    def init_linear(kw, kb):
        w = jax.random.uniform(kw, (D, D), jnp.float32, -bound, bound)
        b = jax.random.uniform(kb, (1, D), jnp.float32, -bound, bound)
        return w, b

    wq, bq = init_linear(keys[1], keys[2])
    wk, bk = init_linear(keys[3], keys[4])
    wv, bv = init_linear(keys[5], keys[6])
    wo, bo = init_linear(keys[7], keys[8])
    params = dict(wq=wq, bq=bq, wk=wk, bk=bk, wv=wv, bv=bv, wo=wo, bo=bo)

    out_x, out_attn = multihead_self_attention(
        q, k, v, value_lengths, params, num_heads=H)   # attn_dtype defaults to bf16
    out_x = jax.block_until_ready(out_x)
    out_attn = jax.block_until_ready(out_attn)

    ref_x, ref_attn = _reference(q, k, v, value_lengths, params, H)

    # x is computed with f32 accumulation throughout; tight tolerance (the folded
    # scale / per-group reassociation contributes only ~1e-6 relative error).
    np.testing.assert_allclose(np.asarray(out_x), np.asarray(ref_x),
                               rtol=2e-3, atol=2e-3)
    # attn is returned in bfloat16 by default (halves the dominant HBM writeback);
    # tolerance covers the bf16 quantization (~2^-8 relative).
    np.testing.assert_allclose(np.asarray(out_attn).astype(np.float32),
                               np.asarray(ref_attn),
                               rtol=2e-2, atol=5e-3)

    print("KERNEL_OK")
</pallas_src>

<mosaic_0001>
module attributes {stable_mosaic.version = 11 : i64} {
  func.func @_mhsa_kernel(%arg0: i32, %arg1: i32, %arg2: memref<1x8x32xf32, #tpu.memory_space<vmem>>, %arg3: memref<1x1x1xi32, #tpu.memory_space<vmem>>, %arg4: memref<1x32x96xf32, #tpu.memory_space<vmem>>, %arg5: memref<1x1x96xf32, #tpu.memory_space<vmem>>, %arg6: memref<1x32x32xf32, #tpu.memory_space<vmem>>, %arg7: memref<1x32xf32, #tpu.memory_space<vmem>>, %arg8: memref<1x8x32xf32, #tpu.memory_space<vmem>>, %arg9: memref<1x4x8x8xbf16, #tpu.memory_space<vmem>>, %arg10: memref<8x32xf32, #tpu.memory_space<vmem>>) attributes {dimension_semantics = [#tpu.dimension_semantics<parallel>, #tpu.dimension_semantics<arbitrary>], iteration_bounds = array<i64: 2, 1>, scalar_prefetch = 0 : i64, scratch_operands = 1 : i64, tpu.core_type = #tpu.core_type<tc>, window_params = [{transform_indices = @transform_0, window_bounds = array<i64: 1, 8, 32>}, {transform_indices = @transform_1, window_bounds = array<i64: 1, 1, 1>}, {pipeline_mode = #tpu.pipeline_mode<synchronous>, transform_indices = @transform_2, window_bounds = array<i64: 1, 32, 96>}, {pipeline_mode = #tpu.pipeline_mode<synchronous>, transform_indices = @transform_3, window_bounds = array<i64: 1, 1, 96>}, {pipeline_mode = #tpu.pipeline_mode<synchronous>, transform_indices = @transform_4, window_bounds = array<i64: 1, 32, 32>}, {pipeline_mode = #tpu.pipeline_mode<synchronous>, transform_indices = @transform_5, window_bounds = array<i64: 1, 32>}, {transform_indices = @transform_6, window_bounds = array<i64: 1, 8, 32>}, {transform_indices = @transform_7, window_bounds = array<i64: 1, 4, 8, 8>}]} {
    %c0_i32 = arith.constant 0 : i32
    %0 = arith.cmpi eq, %arg1, %c0_i32 : i32
    %1 = arith.extui %0 : i1 to i32
    %c0_i32_0 = arith.constant 0 : i32
    %2 = arith.cmpi ne, %1, %c0_i32_0 : i32
    scf.if %2 {
      %cst_55 = arith.constant 0.000000e+00 : f32
      %121 = vector.broadcast %cst_55 : f32 to vector<8x32xf32>
      %c0_56 = arith.constant 0 : index
      %c0_57 = arith.constant 0 : index
      %122 = vector.load %arg10[%c0_56, %c0_57] : memref<8x32xf32, #tpu.memory_space<vmem>>, vector<8x32xf32>
      tpu.vector_store %arg10[%c0_56, %c0_57], %121 {strides = array<i32>} : memref<8x32xf32, #tpu.memory_space<vmem>>, vector<8x32xf32>,
    } else {
    }
    %c0 = arith.constant 0 : index
    %c0_1 = arith.constant 0 : index
    %c0_2 = arith.constant 0 : index
    %3 = vector.load %arg2[%c0, %c0_1, %c0_2] : memref<1x8x32xf32, #tpu.memory_space<vmem>>, vector<1x8x32xf32>
    %4 = vector.shape_cast %3 : vector<1x8x32xf32> to vector<8x32xf32>
    %c0_3 = arith.constant 0 : index
    %c0_4 = arith.constant 0 : index
    %c0_5 = arith.constant 0 : index
    %5 = vector.load %arg4[%c0_3, %c0_4, %c0_5] : memref<1x32x96xf32, #tpu.memory_space<vmem>>, vector<1x32x96xf32>
    %6 = vector.shape_cast %5 : vector<1x32x96xf32> to vector<32x96xf32>
    %cst = arith.constant dense<0.000000e+00> : vector<8x96xf32>
    %7 = tpu.matmul %4, %6, %cst {dimension_numbers = #tpu.dot_dimension_numbers<[1], [0], [0], [1], [0, 0, 1, 1], [], []>} : vector<8x32xf32>, vector<32x96xf32>, vector<8x96xf32> -> vector<8x96xf32>
    %c0_6 = arith.constant 0 : index
    %c0_7 = arith.constant 0 : index
    %c0_8 = arith.constant 0 : index
    %8 = vector.load %arg5[%c0_6, %c0_7, %c0_8] : memref<1x1x96xf32, #tpu.memory_space<vmem>>, vector<1x1x96xf32>
    %9 = vector.shape_cast %8 : vector<1x1x96xf32> to vector<1x96xf32>
    %10 = vector.broadcast %9 : vector<1x96xf32> to vector<8x96xf32>
    %11 = arith.addf %7, %10 : vector<8x96xf32>
    %12 = vector.extract_strided_slice %11 {offsets = [0, 0], sizes = [8, 32], strides = [1, 1]} : vector<8x96xf32> to vector<8x32xf32>
    %13 = vector.shape_cast %12 : vector<8x32xf32> to vector<1x8x32xf32>
    %14 = vector.extract_strided_slice %11 {offsets = [0, 32], sizes = [8, 32], strides = [1, 1]} : vector<8x96xf32> to vector<8x32xf32>
    %15 = vector.shape_cast %14 : vector<8x32xf32> to vector<1x8x32xf32>
    %16 = vector.extract_strided_slice %11 {offsets = [0, 64], sizes = [8, 32], strides = [1, 1]} : vector<8x96xf32> to vector<8x32xf32>
    %17 = vector.shape_cast %16 : vector<8x32xf32> to vector<1x8x32xf32>
    %18 = tpu.iota {dimensions = array<i32: 2>} : vector<1x1x8xi32>
    %c0_9 = arith.constant 0 : index
    %c0_10 = arith.constant 0 : index
    %c0_11 = arith.constant 0 : index
    %19 = vector.load %arg3[%c0_9, %c0_10, %c0_11] : memref<1x1x1xi32, #tpu.memory_space<vmem>>, vector<1x1x1xi32>
    %20 = vector.broadcast %19 : vector<1x1x1xi32> to vector<1x1x8xi32>
    %21 = arith.cmpi sge, %18, %20 : vector<1x1x8xi32>
    %22 = vector.extract_strided_slice %13 {offsets = [0, 0, 0], sizes = [1, 8, 8], strides = [1, 1, 1]} : vector<1x8x32xf32> to vector<1x8x8xf32>
    %23 = vector.extract_strided_slice %15 {offsets = [0, 0, 0], sizes = [1, 8, 8], strides = [1, 1, 1]} : vector<1x8x32xf32> to vector<1x8x8xf32>
    %24 = vector.extract_strided_slice %17 {offsets = [0, 0, 0], sizes = [1, 8, 8], strides = [1, 1, 1]} : vector<1x8x32xf32> to vector<1x8x8xf32>
    "tpu.trace_start"() <{level = 10 : i32, message = "bqd,bkd->bqk"}> : () -> ()
    %cst_12 = arith.constant dense<0.000000e+00> : vector<1x8x8xf32>
    %25 = tpu.matmul %22, %23, %cst_12 {dimension_numbers = #tpu.dot_dimension_numbers<[2], [2], [1], [1], [0, 0, 0, 1, 1, 1], [0], [0]>} : vector<1x8x8xf32>, vector<1x8x8xf32>, vector<1x8x8xf32> -> vector<1x8x8xf32>
    %cst_13 = arith.constant -1.000000e+30 : f32
    "tpu.trace_stop"() : () -> ()
    %26 = vector.shape_cast %21 : vector<1x1x8xi1> to vector<1x1x8xi1>
    %27 = vector.broadcast %26 : vector<1x1x8xi1> to vector<1x8x8xi1>
    %28 = vector.broadcast %cst_13 : f32 to vector<1x8x8xf32>
    %29 = arith.select %27, %28, %25 : vector<1x8x8xi1>, vector<1x8x8xf32>
    %cst_14 = arith.constant dense<0xFF800000> : vector<1x8xf32>
    %30 = vector.multi_reduction <maximumf>, %29, %cst_14 [2] : vector<1x8x8xf32> to vector<1x8xf32>
    %31 = vector.shape_cast %30 : vector<1x8xf32> to vector<1x8x1xf32>
    %32 = vector.broadcast %31 : vector<1x8x1xf32> to vector<1x8x8xf32>
    %33 = arith.subf %29, %32 : vector<1x8x8xf32>
    %34 = math.exp %33 : vector<1x8x8xf32>
    %cst_15 = arith.constant dense<0.000000e+00> : vector<1x8xf32>
    %35 = vector.multi_reduction <add>, %34, %cst_15 [2] : vector<1x8x8xf32> to vector<1x8xf32>
    %36 = vector.shape_cast %35 : vector<1x8xf32> to vector<1x8x1xf32>
    %37 = vector.broadcast %36 : vector<1x8x1xf32> to vector<1x8x8xf32>
    %38 = arith.divf %34, %37 : vector<1x8x8xf32>
    %39 = arith.truncf %38 : vector<1x8x8xf32> to vector<1x8x8xbf16>
    %c0_16 = arith.constant 0 : index
    %c0_17 = arith.constant 0 : index
    %c0_18 = arith.constant 0 : index
    %c0_19 = arith.constant 0 : index
    %40 = vector.load %arg9[%c0_16, %c0_17, %c0_18, %c0_19] : memref<1x4x8x8xbf16, #tpu.memory_space<vmem>>, vector<1x1x8x8xbf16>
    %41 = vector.shape_cast %40 : vector<1x1x8x8xbf16> to vector<1x8x8xbf16>
    %42 = vector.shape_cast %39 : vector<1x8x8xbf16> to vector<1x1x8x8xbf16>
    tpu.vector_store %arg9[%c0_16, %c0_17, %c0_18, %c0_19], %42 {strides = array<i32>} : memref<1x4x8x8xbf16, #tpu.memory_space<vmem>>, vector<1x1x8x8xbf16>,
    "tpu.trace_start"() <{level = 10 : i32, message = "bqk,bkd->bqd"}> : () -> ()
    %cst_20 = arith.constant dense<0.000000e+00> : vector<1x8x8xf32>
    %43 = tpu.matmul %38, %24, %cst_20 {dimension_numbers = #tpu.dot_dimension_numbers<[2], [1], [1], [2], [0, 0, 0, 1, 1, 2], [0], [0]>} : vector<1x8x8xf32>, vector<1x8x8xf32>, vector<1x8x8xf32> -> vector<1x8x8xf32>
    "tpu.trace_stop"() : () -> ()
    %44 = vector.extract_strided_slice %13 {offsets = [0, 0, 8], sizes = [1, 8, 8], strides = [1, 1, 1]} : vector<1x8x32xf32> to vector<1x8x8xf32>
    %45 = vector.extract_strided_slice %15 {offsets = [0, 0, 8], sizes = [1, 8, 8], strides = [1, 1, 1]} : vector<1x8x32xf32> to vector<1x8x8xf32>
    %46 = vector.extract_strided_slice %17 {offsets = [0, 0, 8], sizes = [1, 8, 8], strides = [1, 1, 1]} : vector<1x8x32xf32> to vector<1x8x8xf32>
    "tpu.trace_start"() <{level = 10 : i32, message = "bqd,bkd->bqk"}> : () -> ()
    %cst_21 = arith.constant dense<0.000000e+00> : vector<1x8x8xf32>
    %47 = tpu.matmul %44, %45, %cst_21 {dimension_numbers = #tpu.dot_dimension_numbers<[2], [2], [1], [1], [0, 0, 0, 1, 1, 1], [0], [0]>} : vector<1x8x8xf32>, vector<1x8x8xf32>, vector<1x8x8xf32> -> vector<1x8x8xf32>
    %cst_22 = arith.constant -1.000000e+30 : f32
    "tpu.trace_stop"() : () -> ()
    %48 = vector.shape_cast %21 : vector<1x1x8xi1> to vector<1x1x8xi1>
    %49 = vector.broadcast %48 : vector<1x1x8xi1> to vector<1x8x8xi1>
    %50 = vector.broadcast %cst_22 : f32 to vector<1x8x8xf32>
    %51 = arith.select %49, %50, %47 : vector<1x8x8xi1>, vector<1x8x8xf32>
    %cst_23 = arith.constant dense<0xFF800000> : vector<1x8xf32>
    %52 = vector.multi_reduction <maximumf>, %51, %cst_23 [2] : vector<1x8x8xf32> to vector<1x8xf32>
    %53 = vector.shape_cast %52 : vector<1x8xf32> to vector<1x8x1xf32>
    %54 = vector.broadcast %53 : vector<1x8x1xf32> to vector<1x8x8xf32>
    %55 = arith.subf %51, %54 : vector<1x8x8xf32>
    %56 = math.exp %55 : vector<1x8x8xf32>
    %cst_24 = arith.constant dense<0.000000e+00> : vector<1x8xf32>
    %57 = vector.multi_reduction <add>, %56, %cst_24 [2] : vector<1x8x8xf32> to vector<1x8xf32>
    %58 = vector.shape_cast %57 : vector<1x8xf32> to vector<1x8x1xf32>
    %59 = vector.broadcast %58 : vector<1x8x1xf32> to vector<1x8x8xf32>
    %60 = arith.divf %56, %59 : vector<1x8x8xf32>
    %61 = arith.truncf %60 : vector<1x8x8xf32> to vector<1x8x8xbf16>
    %c0_25 = arith.constant 0 : index
    %c1 = arith.constant 1 : index
    %c0_26 = arith.constant 0 : index
    %c0_27 = arith.constant 0 : index
    %62 = vector.load %arg9[%c0_25, %c1, %c0_26, %c0_27] : memref<1x4x8x8xbf16, #tpu.memory_space<vmem>>, vector<1x1x8x8xbf16>
    %63 = vector.shape_cast %62 : vector<1x1x8x8xbf16> to vector<1x8x8xbf16>
    %64 = vector.shape_cast %61 : vector<1x8x8xbf16> to vector<1x1x8x8xbf16>
    tpu.vector_store %arg9[%c0_25, %c1, %c0_26, %c0_27], %64 {strides = array<i32>} : memref<1x4x8x8xbf16, #tpu.memory_space<vmem>>, vector<1x1x8x8xbf16>,
    "tpu.trace_start"() <{level = 10 : i32, message = "bqk,bkd->bqd"}> : () -> ()
    %cst_28 = arith.constant dense<0.000000e+00> : vector<1x8x8xf32>
    %65 = tpu.matmul %60, %46, %cst_28 {dimension_numbers = #tpu.dot_dimension_numbers<[2], [1], [1], [2], [0, 0, 0, 1, 1, 2], [0], [0]>} : vector<1x8x8xf32>, vector<1x8x8xf32>, vector<1x8x8xf32> -> vector<1x8x8xf32>
    "tpu.trace_stop"() : () -> ()
    %66 = vector.extract_strided_slice %13 {offsets = [0, 0, 16], sizes = [1, 8, 8], strides = [1, 1, 1]} : vector<1x8x32xf32> to vector<1x8x8xf32>
    %67 = vector.extract_strided_slice %15 {offsets = [0, 0, 16], sizes = [1, 8, 8], strides = [1, 1, 1]} : vector<1x8x32xf32> to vector<1x8x8xf32>
    %68 = vector.extract_strided_slice %17 {offsets = [0, 0, 16], sizes = [1, 8, 8], strides = [1, 1, 1]} : vector<1x8x32xf32> to vector<1x8x8xf32>
    "tpu.trace_start"() <{level = 10 : i32, message = "bqd,bkd->bqk"}> : () -> ()
    %cst_29 = arith.constant dense<0.000000e+00> : vector<1x8x8xf32>
    %69 = tpu.matmul %66, %67, %cst_29 {dimension_numbers = #tpu.dot_dimension_numbers<[2], [2], [1], [1], [0, 0, 0, 1, 1, 1], [0], [0]>} : vector<1x8x8xf32>, vector<1x8x8xf32>, vector<1x8x8xf32> -> vector<1x8x8xf32>
    %cst_30 = arith.constant -1.000000e+30 : f32
    "tpu.trace_stop"() : () -> ()
    %70 = vector.shape_cast %21 : vector<1x1x8xi1> to vector<1x1x8xi1>
    %71 = vector.broadcast %70 : vector<1x1x8xi1> to vector<1x8x8xi1>
    %72 = vector.broadcast %cst_30 : f32 to vector<1x8x8xf32>
    %73 = arith.select %71, %72, %69 : vector<1x8x8xi1>, vector<1x8x8xf32>
    %cst_31 = arith.constant dense<0xFF800000> : vector<1x8xf32>
    %74 = vector.multi_reduction <maximumf>, %73, %cst_31 [2] : vector<1x8x8xf32> to vector<1x8xf32>
    %75 = vector.shape_cast %74 : vector<1x8xf32> to vector<1x8x1xf32>
    %76 = vector.broadcast %75 : vector<1x8x1xf32> to vector<1x8x8xf32>
    %77 = arith.subf %73, %76 : vector<1x8x8xf32>
    %78 = math.exp %77 : vector<1x8x8xf32>
    %cst_32 = arith.constant dense<0.000000e+00> : vector<1x8xf32>
    %79 = vector.multi_reduction <add>, %78, %cst_32 [2] : vector<1x8x8xf32> to vector<1x8xf32>
    %80 = vector.shape_cast %79 : vector<1x8xf32> to vector<1x8x1xf32>
    %81 = vector.broadcast %80 : vector<1x8x1xf32> to vector<1x8x8xf32>
    %82 = arith.divf %78, %81 : vector<1x8x8xf32>
    %83 = arith.truncf %82 : vector<1x8x8xf32> to vector<1x8x8xbf16>
    %c0_33 = arith.constant 0 : index
    %c2 = arith.constant 2 : index
    %c0_34 = arith.constant 0 : index
    %c0_35 = arith.constant 0 : index
    %84 = vector.load %arg9[%c0_33, %c2, %c0_34, %c0_35] : memref<1x4x8x8xbf16, #tpu.memory_space<vmem>>, vector<1x1x8x8xbf16>
    %85 = vector.shape_cast %84 : vector<1x1x8x8xbf16> to vector<1x8x8xbf16>
    %86 = vector.shape_cast %83 : vector<1x8x8xbf16> to vector<1x1x8x8xbf16>
    tpu.vector_store %arg9[%c0_33, %c2, %c0_34, %c0_35], %86 {strides = array<i32>} : memref<1x4x8x8xbf16, #tpu.memory_space<vmem>>, vector<1x1x8x8xbf16>,
    "tpu.trace_start"() <{level = 10 : i32, message = "bqk,bkd->bqd"}> : () -> ()
    %cst_36 = arith.constant dense<0.000000e+00> : vector<1x8x8xf32>
    %87 = tpu.matmul %82, %68, %cst_36 {dimension_numbers = #tpu.dot_dimension_numbers<[2], [1], [1], [2], [0, 0, 0, 1, 1, 2], [0], [0]>} : vector<1x8x8xf32>, vector<1x8x8xf32>, vector<1x8x8xf32> -> vector<1x8x8xf32>
    "tpu.trace_stop"() : () -> ()
    %88 = vector.extract_strided_slice %13 {offsets = [0, 0, 24], sizes = [1, 8, 8], strides = [1, 1, 1]} : vector<1x8x32xf32> to vector<1x8x8xf32>
    %89 = vector.extract_strided_slice %15 {offsets = [0, 0, 24], sizes = [1, 8, 8], strides = [1, 1, 1]} : vector<1x8x32xf32> to vector<1x8x8xf32>
    %90 = vector.extract_strided_slice %17 {offsets = [0, 0, 24], sizes = [1, 8, 8], strides = [1, 1, 1]} : vector<1x8x32xf32> to vector<1x8x8xf32>
    "tpu.trace_start"() <{level = 10 : i32, message = "bqd,bkd->bqk"}> : () -> ()
    %cst_37 = arith.constant dense<0.000000e+00> : vector<1x8x8xf32>
    %91 = tpu.matmul %88, %89, %cst_37 {dimension_numbers = #tpu.dot_dimension_numbers<[2], [2], [1], [1], [0, 0, 0, 1, 1, 1], [0], [0]>} : vector<1x8x8xf32>, vector<1x8x8xf32>, vector<1x8x8xf32> -> vector<1x8x8xf32>
    %cst_38 = arith.constant -1.000000e+30 : f32
    "tpu.trace_stop"() : () -> ()
    %92 = vector.shape_cast %21 : vector<1x1x8xi1> to vector<1x1x8xi1>
    %93 = vector.broadcast %92 : vector<1x1x8xi1> to vector<1x8x8xi1>
    %94 = vector.broadcast %cst_38 : f32 to vector<1x8x8xf32>
    %95 = arith.select %93, %94, %91 : vector<1x8x8xi1>, vector<1x8x8xf32>
    %cst_39 = arith.constant dense<0xFF800000> : vector<1x8xf32>
    %96 = vector.multi_reduction <maximumf>, %95, %cst_39 [2] : vector<1x8x8xf32> to vector<1x8xf32>
    %97 = vector.shape_cast %96 : vector<1x8xf32> to vector<1x8x1xf32>
    %98 = vector.broadcast %97 : vector<1x8x1xf32> to vector<1x8x8xf32>
    %99 = arith.subf %95, %98 : vector<1x8x8xf32>
    %100 = math.exp %99 : vector<1x8x8xf32>
    %cst_40 = arith.constant dense<0.000000e+00> : vector<1x8xf32>
    %101 = vector.multi_reduction <add>, %100, %cst_40 [2] : vector<1x8x8xf32> to vector<1x8xf32>
    %102 = vector.shape_cast %101 : vector<1x8xf32> to vector<1x8x1xf32>
    %103 = vector.broadcast %102 : vector<1x8x1xf32> to vector<1x8x8xf32>
    %104 = arith.divf %100, %103 : vector<1x8x8xf32>
    %105 = arith.truncf %104 : vector<1x8x8xf32> to vector<1x8x8xbf16>
    %c0_41 = arith.constant 0 : index
    %c3 = arith.constant 3 : index
    %c0_42 = arith.constant 0 : index
    %c0_43 = arith.constant 0 : index
    %106 = vector.load %arg9[%c0_41, %c3, %c0_42, %c0_43] : memref<1x4x8x8xbf16, #tpu.memory_space<vmem>>, vector<1x1x8x8xbf16>
    %107 = vector.shape_cast %106 : vector<1x1x8x8xbf16> to vector<1x8x8xbf16>
    %108 = vector.shape_cast %105 : vector<1x8x8xbf16> to vector<1x1x8x8xbf16>
    tpu.vector_store %arg9[%c0_41, %c3, %c0_42, %c0_43], %108 {strides = array<i32>} : memref<1x4x8x8xbf16, #tpu.memory_space<vmem>>, vector<1x1x8x8xbf16>,
    "tpu.trace_start"() <{level = 10 : i32, message = "bqk,bkd->bqd"}> : () -> ()
    %cst_44 = arith.constant dense<0.000000e+00> : vector<1x8x8xf32>
    %109 = tpu.matmul %104, %90, %cst_44 {dimension_numbers = #tpu.dot_dimension_numbers<[2], [1], [1], [2], [0, 0, 0, 1, 1, 2], [0], [0]>} : vector<1x8x8xf32>, vector<1x8x8xf32>, vector<1x8x8xf32> -> vector<1x8x8xf32>
    "tpu.trace_stop"() : () -> ()
    %110 = tpu.concatenate %43, %65, %87, %109 in 2 : vector<1x8x8xf32>, vector<1x8x8xf32>, vector<1x8x8xf32>, vector<1x8x8xf32> -> vector<1x8x32xf32>
    %c0_45 = arith.constant 0 : index
    %c0_46 = arith.constant 0 : index
    %111 = vector.load %arg10[%c0_45, %c0_46] : memref<8x32xf32, #tpu.memory_space<vmem>>, vector<8x32xf32>
    %112 = vector.shape_cast %110 : vector<1x8x32xf32> to vector<8x32xf32>
    %c0_47 = arith.constant 0 : index
    %c0_48 = arith.constant 0 : index
    %c0_49 = arith.constant 0 : index
    %113 = vector.load %arg6[%c0_47, %c0_48, %c0_49] : memref<1x32x32xf32, #tpu.memory_space<vmem>>, vector<1x32x32xf32>
    %114 = vector.shape_cast %113 : vector<1x32x32xf32> to vector<32x32xf32>
    %cst_50 = arith.constant dense<0.000000e+00> : vector<8x32xf32>
    %115 = tpu.matmul %112, %114, %cst_50 {dimension_numbers = #tpu.dot_dimension_numbers<[1], [0], [0], [1], [0, 0, 1, 1], [], []>} : vector<8x32xf32>, vector<32x32xf32>, vector<8x32xf32> -> vector<8x32xf32>
    %116 = arith.addf %111, %115 : vector<8x32xf32>
    %c0_51 = arith.constant 0 : index
    %c0_52 = arith.constant 0 : index
    %117 = vector.load %arg10[%c0_51, %c0_52] : memref<8x32xf32, #tpu.memory_space<vmem>>, vector<8x32xf32>
    tpu.vector_store %arg10[%c0_51, %c0_52], %116 {strides = array<i32>} : memref<8x32xf32, #tpu.memory_space<vmem>>, vector<8x32xf32>,
    %c0_i32_53 = arith.constant 0 : i32
    %118 = arith.cmpi eq, %arg1, %c0_i32_53 : i32
    %119 = arith.extui %118 : i1 to i32
    %c0_i32_54 = arith.constant 0 : i32
    %120 = arith.cmpi ne, %119, %c0_i32_54 : i32
    scf.if %120 {
      %c0_55 = arith.constant 0 : index
      %c0_56 = arith.constant 0 : index
      %121 = vector.load %arg10[%c0_55, %c0_56] : memref<8x32xf32, #tpu.memory_space<vmem>>, vector<8x32xf32>
      %c0_57 = arith.constant 0 : index
      %c0_58 = arith.constant 0 : index
      %122 = vector.load %arg7[%c0_57, %c0_58] : memref<1x32xf32, #tpu.memory_space<vmem>>, vector<1x32xf32>
      %123 = vector.broadcast %122 : vector<1x32xf32> to vector<8x32xf32>
      %124 = arith.addf %121, %123 : vector<8x32xf32>
      %125 = vector.shape_cast %124 : vector<8x32xf32> to vector<1x8x32xf32>
      %c0_59 = arith.constant 0 : index
      %c0_60 = arith.constant 0 : index
      %c0_61 = arith.constant 0 : index
      %126 = vector.load %arg8[%c0_59, %c0_60, %c0_61] : memref<1x8x32xf32, #tpu.memory_space<vmem>>, vector<1x8x32xf32>
      tpu.vector_store %arg8[%c0_59, %c0_60, %c0_61], %125 {strides = array<i32>} : memref<1x8x32xf32, #tpu.memory_space<vmem>>, vector<1x8x32xf32>,
    } else {
    }
    return
  }
  func.func @transform_0(%arg0: i32, %arg1: i32) -> (i32, i32, i32) {
    %c0_i32 = arith.constant 0 : i32
    %c0_i32_0 = arith.constant 0 : i32
    %c0_i32_1 = arith.constant 0 : i32
    return %arg0, %c0_i32, %c0_i32_0 : i32, i32, i32
  }
  func.func @transform_1(%arg0: i32, %arg1: i32) -> (i32, i32, i32) {
    %c0_i32 = arith.constant 0 : i32
    %c0_i32_0 = arith.constant 0 : i32
    %c0_i32_1 = arith.constant 0 : i32
    return %arg0, %c0_i32, %c0_i32_0 : i32, i32, i32
  }
  func.func @transform_2(%arg0: i32, %arg1: i32) -> (i32, i32, i32) {
    %c0_i32 = arith.constant 0 : i32
    %c0_i32_0 = arith.constant 0 : i32
    %c0_i32_1 = arith.constant 0 : i32
    return %arg1, %c0_i32, %c0_i32_0 : i32, i32, i32
  }
  func.func @transform_3(%arg0: i32, %arg1: i32) -> (i32, i32, i32) {
    %c0_i32 = arith.constant 0 : i32
    %c0_i32_0 = arith.constant 0 : i32
    %c0_i32_1 = arith.constant 0 : i32
    return %arg1, %c0_i32, %c0_i32_0 : i32, i32, i32
  }
  func.func @transform_4(%arg0: i32, %arg1: i32) -> (i32, i32, i32) {
    %c0_i32 = arith.constant 0 : i32
    %c0_i32_0 = arith.constant 0 : i32
    %c0_i32_1 = arith.constant 0 : i32
    return %arg1, %c0_i32, %c0_i32_0 : i32, i32, i32
  }
  func.func @transform_5(%arg0: i32, %arg1: i32) -> (i32, i32) {
    %c0_i32 = arith.constant 0 : i32
    %c0_i32_0 = arith.constant 0 : i32
    %c0_i32_1 = arith.constant 0 : i32
    return %c0_i32, %c0_i32_0 : i32, i32
  }
  func.func @transform_6(%arg0: i32, %arg1: i32) -> (i32, i32, i32) {
    %c0_i32 = arith.constant 0 : i32
    %c0_i32_0 = arith.constant 0 : i32
    %c0_i32_1 = arith.constant 0 : i32
    return %arg0, %c0_i32, %c0_i32_0 : i32, i32, i32
  }
  func.func @transform_7(%arg0: i32, %arg1: i32) -> (i32, i32, i32, i32) {
    %c0_i32 = arith.constant 0 : i32
    %c0_i32_0 = arith.constant 0 : i32
    %c0_i32_1 = arith.constant 0 : i32
    return %arg0, %arg1, %c0_i32, %c0_i32_0 : i32, i32, i32, i32
  }
}

module attributes {stable_mosaic.version = 11 : i64} {
  func.func @_mhsa_kernel(%arg0: i32, %arg1: i32, %arg2: memref<1x8x32xf32, #tpu.memory_space<vmem>>, %arg3: memref<1x1x1xi32, #tpu.memory_space<vmem>>, %arg4: memref<1x32x96xf32, #tpu.memory_space<vmem>>, %arg5: memref<1x1x96xf32, #tpu.memory_space<vmem>>, %arg6: memref<1x32x32xf32, #tpu.memory_space<vmem>>, %arg7: memref<1x32xf32, #tpu.memory_space<vmem>>, %arg8: memref<1x8x32xf32, #tpu.memory_space<vmem>>, %arg9: memref<1x4x8x8xbf16, #tpu.memory_space<vmem>>, %arg10: memref<8x32xf32, #tpu.memory_space<vmem>>) attributes {dimension_semantics = [#tpu.dimension_semantics<parallel>, #tpu.dimension_semantics<arbitrary>], iteration_bounds = array<i64: 2, 1>, scalar_prefetch = 0 : i64, scratch_operands = 1 : i64, tpu.core_type = #tpu.core_type<tc>, window_params = [{transform_indices = @transform_0, window_bounds = array<i64: 1, 8, 32>}, {transform_indices = @transform_1, window_bounds = array<i64: 1, 1, 1>}, {transform_indices = @transform_2, window_bounds = array<i64: 1, 32, 96>}, {transform_indices = @transform_3, window_bounds = array<i64: 1, 1, 96>}, {transform_indices = @transform_4, window_bounds = array<i64: 1, 32, 32>}, {pipeline_mode = #tpu.pipeline_mode<synchronous>, transform_indices = @transform_5, window_bounds = array<i64: 1, 32>}, {transform_indices = @transform_6, window_bounds = array<i64: 1, 8, 32>}, {transform_indices = @transform_7, window_bounds = array<i64: 1, 4, 8, 8>}]} {
    %c0_i32 = arith.constant 0 : i32
    %0 = arith.cmpi eq, %arg1, %c0_i32 : i32
    %1 = arith.extui %0 : i1 to i32
    %c0_i32_0 = arith.constant 0 : i32
    %2 = arith.cmpi ne, %1, %c0_i32_0 : i32
    scf.if %2 {
      %cst_55 = arith.constant 0.000000e+00 : f32
      %121 = vector.broadcast %cst_55 : f32 to vector<8x32xf32>
      %c0_56 = arith.constant 0 : index
      %c0_57 = arith.constant 0 : index
      %122 = vector.load %arg10[%c0_56, %c0_57] : memref<8x32xf32, #tpu.memory_space<vmem>>, vector<8x32xf32>
      tpu.vector_store %arg10[%c0_56, %c0_57], %121 {strides = array<i32>} : memref<8x32xf32, #tpu.memory_space<vmem>>, vector<8x32xf32>,
    } else {
    }
    %c0 = arith.constant 0 : index
    %c0_1 = arith.constant 0 : index
    %c0_2 = arith.constant 0 : index
    %3 = vector.load %arg2[%c0, %c0_1, %c0_2] : memref<1x8x32xf32, #tpu.memory_space<vmem>>, vector<1x8x32xf32>
    %4 = vector.shape_cast %3 : vector<1x8x32xf32> to vector<8x32xf32>
    %c0_3 = arith.constant 0 : index
    %c0_4 = arith.constant 0 : index
    %c0_5 = arith.constant 0 : index
    %5 = vector.load %arg4[%c0_3, %c0_4, %c0_5] : memref<1x32x96xf32, #tpu.memory_space<vmem>>, vector<1x32x96xf32>
    %6 = vector.shape_cast %5 : vector<1x32x96xf32> to vector<32x96xf32>
    %cst = arith.constant dense<0.000000e+00> : vector<8x96xf32>
    %7 = tpu.matmul %4, %6, %cst {dimension_numbers = #tpu.dot_dimension_numbers<[1], [0], [0], [1], [0, 0, 1, 1], [], []>} : vector<8x32xf32>, vector<32x96xf32>, vector<8x96xf32> -> vector<8x96xf32>
    %c0_6 = arith.constant 0 : index
    %c0_7 = arith.constant 0 : index
    %c0_8 = arith.constant 0 : index
    %8 = vector.load %arg5[%c0_6, %c0_7, %c0_8] : memref<1x1x96xf32, #tpu.memory_space<vmem>>, vector<1x1x96xf32>
    %9 = vector.shape_cast %8 : vector<1x1x96xf32> to vector<1x96xf32>
    %10 = vector.broadcast %9 : vector<1x96xf32> to vector<8x96xf32>
    %11 = arith.addf %7, %10 : vector<8x96xf32>
    %12 = vector.extract_strided_slice %11 {offsets = [0, 0], sizes = [8, 32], strides = [1, 1]} : vector<8x96xf32> to vector<8x32xf32>
    %13 = vector.shape_cast %12 : vector<8x32xf32> to vector<1x8x32xf32>
    %14 = vector.extract_strided_slice %11 {offsets = [0, 32], sizes = [8, 32], strides = [1, 1]} : vector<8x96xf32> to vector<8x32xf32>
    %15 = vector.shape_cast %14 : vector<8x32xf32> to vector<1x8x32xf32>
    %16 = vector.extract_strided_slice %11 {offsets = [0, 64], sizes = [8, 32], strides = [1, 1]} : vector<8x96xf32> to vector<8x32xf32>
    %17 = vector.shape_cast %16 : vector<8x32xf32> to vector<1x8x32xf32>
    %18 = tpu.iota {dimensions = array<i32: 2>} : vector<1x1x8xi32>
    %c0_9 = arith.constant 0 : index
    %c0_10 = arith.constant 0 : index
    %c0_11 = arith.constant 0 : index
    %19 = vector.load %arg3[%c0_9, %c0_10, %c0_11] : memref<1x1x1xi32, #tpu.memory_space<vmem>>, vector<1x1x1xi32>
    %20 = vector.broadcast %19 : vector<1x1x1xi32> to vector<1x1x8xi32>
    %21 = arith.cmpi sge, %18, %20 : vector<1x1x8xi32>
    %22 = vector.extract_strided_slice %13 {offsets = [0, 0, 0], sizes = [1, 8, 8], strides = [1, 1, 1]} : vector<1x8x32xf32> to vector<1x8x8xf32>
    %23 = vector.extract_strided_slice %15 {offsets = [0, 0, 0], sizes = [1, 8, 8], strides = [1, 1, 1]} : vector<1x8x32xf32> to vector<1x8x8xf32>
    %24 = vector.extract_strided_slice %17 {offsets = [0, 0, 0], sizes = [1, 8, 8], strides = [1, 1, 1]} : vector<1x8x32xf32> to vector<1x8x8xf32>
    "tpu.trace_start"() <{level = 10 : i32, message = "bqd,bkd->bqk"}> : () -> ()
    %cst_12 = arith.constant dense<0.000000e+00> : vector<1x8x8xf32>
    %25 = tpu.matmul %22, %23, %cst_12 {dimension_numbers = #tpu.dot_dimension_numbers<[2], [2], [1], [1], [0, 0, 0, 1, 1, 1], [0], [0]>} : vector<1x8x8xf32>, vector<1x8x8xf32>, vector<1x8x8xf32> -> vector<1x8x8xf32>
    %cst_13 = arith.constant -1.000000e+30 : f32
    "tpu.trace_stop"() : () -> ()
    %26 = vector.shape_cast %21 : vector<1x1x8xi1> to vector<1x1x8xi1>
    %27 = vector.broadcast %26 : vector<1x1x8xi1> to vector<1x8x8xi1>
    %28 = vector.broadcast %cst_13 : f32 to vector<1x8x8xf32>
    %29 = arith.select %27, %28, %25 : vector<1x8x8xi1>, vector<1x8x8xf32>
    %cst_14 = arith.constant dense<0xFF800000> : vector<1x8xf32>
    %30 = vector.multi_reduction <maximumf>, %29, %cst_14 [2] : vector<1x8x8xf32> to vector<1x8xf32>
    %31 = vector.shape_cast %30 : vector<1x8xf32> to vector<1x8x1xf32>
    %32 = vector.broadcast %31 : vector<1x8x1xf32> to vector<1x8x8xf32>
    %33 = arith.subf %29, %32 : vector<1x8x8xf32>
    %34 = math.exp %33 : vector<1x8x8xf32>
    %cst_15 = arith.constant dense<0.000000e+00> : vector<1x8xf32>
    %35 = vector.multi_reduction <add>, %34, %cst_15 [2] : vector<1x8x8xf32> to vector<1x8xf32>
    %36 = vector.shape_cast %35 : vector<1x8xf32> to vector<1x8x1xf32>
    %37 = vector.broadcast %36 : vector<1x8x1xf32> to vector<1x8x8xf32>
    %38 = arith.divf %34, %37 : vector<1x8x8xf32>
    %39 = arith.truncf %38 : vector<1x8x8xf32> to vector<1x8x8xbf16>
    %c0_16 = arith.constant 0 : index
    %c0_17 = arith.constant 0 : index
    %c0_18 = arith.constant 0 : index
    %c0_19 = arith.constant 0 : index
    %40 = vector.load %arg9[%c0_16, %c0_17, %c0_18, %c0_19] : memref<1x4x8x8xbf16, #tpu.memory_space<vmem>>, vector<1x1x8x8xbf16>
    %41 = vector.shape_cast %40 : vector<1x1x8x8xbf16> to vector<1x8x8xbf16>
    %42 = vector.shape_cast %39 : vector<1x8x8xbf16> to vector<1x1x8x8xbf16>
    tpu.vector_store %arg9[%c0_16, %c0_17, %c0_18, %c0_19], %42 {strides = array<i32>} : memref<1x4x8x8xbf16, #tpu.memory_space<vmem>>, vector<1x1x8x8xbf16>,
    "tpu.trace_start"() <{level = 10 : i32, message = "bqk,bkd->bqd"}> : () -> ()
    %cst_20 = arith.constant dense<0.000000e+00> : vector<1x8x8xf32>
    %43 = tpu.matmul %38, %24, %cst_20 {dimension_numbers = #tpu.dot_dimension_numbers<[2], [1], [1], [2], [0, 0, 0, 1, 1, 2], [0], [0]>} : vector<1x8x8xf32>, vector<1x8x8xf32>, vector<1x8x8xf32> -> vector<1x8x8xf32>
    "tpu.trace_stop"() : () -> ()
    %44 = vector.extract_strided_slice %13 {offsets = [0, 0, 8], sizes = [1, 8, 8], strides = [1, 1, 1]} : vector<1x8x32xf32> to vector<1x8x8xf32>
    %45 = vector.extract_strided_slice %15 {offsets = [0, 0, 8], sizes = [1, 8, 8], strides = [1, 1, 1]} : vector<1x8x32xf32> to vector<1x8x8xf32>
    %46 = vector.extract_strided_slice %17 {offsets = [0, 0, 8], sizes = [1, 8, 8], strides = [1, 1, 1]} : vector<1x8x32xf32> to vector<1x8x8xf32>
    "tpu.trace_start"() <{level = 10 : i32, message = "bqd,bkd->bqk"}> : () -> ()
    %cst_21 = arith.constant dense<0.000000e+00> : vector<1x8x8xf32>
    %47 = tpu.matmul %44, %45, %cst_21 {dimension_numbers = #tpu.dot_dimension_numbers<[2], [2], [1], [1], [0, 0, 0, 1, 1, 1], [0], [0]>} : vector<1x8x8xf32>, vector<1x8x8xf32>, vector<1x8x8xf32> -> vector<1x8x8xf32>
    %cst_22 = arith.constant -1.000000e+30 : f32
    "tpu.trace_stop"() : () -> ()
    %48 = vector.shape_cast %21 : vector<1x1x8xi1> to vector<1x1x8xi1>
    %49 = vector.broadcast %48 : vector<1x1x8xi1> to vector<1x8x8xi1>
    %50 = vector.broadcast %cst_22 : f32 to vector<1x8x8xf32>
    %51 = arith.select %49, %50, %47 : vector<1x8x8xi1>, vector<1x8x8xf32>
    %cst_23 = arith.constant dense<0xFF800000> : vector<1x8xf32>
    %52 = vector.multi_reduction <maximumf>, %51, %cst_23 [2] : vector<1x8x8xf32> to vector<1x8xf32>
    %53 = vector.shape_cast %52 : vector<1x8xf32> to vector<1x8x1xf32>
    %54 = vector.broadcast %53 : vector<1x8x1xf32> to vector<1x8x8xf32>
    %55 = arith.subf %51, %54 : vector<1x8x8xf32>
    %56 = math.exp %55 : vector<1x8x8xf32>
    %cst_24 = arith.constant dense<0.000000e+00> : vector<1x8xf32>
    %57 = vector.multi_reduction <add>, %56, %cst_24 [2] : vector<1x8x8xf32> to vector<1x8xf32>
    %58 = vector.shape_cast %57 : vector<1x8xf32> to vector<1x8x1xf32>
    %59 = vector.broadcast %58 : vector<1x8x1xf32> to vector<1x8x8xf32>
    %60 = arith.divf %56, %59 : vector<1x8x8xf32>
    %61 = arith.truncf %60 : vector<1x8x8xf32> to vector<1x8x8xbf16>
    %c0_25 = arith.constant 0 : index
    %c1 = arith.constant 1 : index
    %c0_26 = arith.constant 0 : index
    %c0_27 = arith.constant 0 : index
    %62 = vector.load %arg9[%c0_25, %c1, %c0_26, %c0_27] : memref<1x4x8x8xbf16, #tpu.memory_space<vmem>>, vector<1x1x8x8xbf16>
    %63 = vector.shape_cast %62 : vector<1x1x8x8xbf16> to vector<1x8x8xbf16>
    %64 = vector.shape_cast %61 : vector<1x8x8xbf16> to vector<1x1x8x8xbf16>
    tpu.vector_store %arg9[%c0_25, %c1, %c0_26, %c0_27], %64 {strides = array<i32>} : memref<1x4x8x8xbf16, #tpu.memory_space<vmem>>, vector<1x1x8x8xbf16>,
    "tpu.trace_start"() <{level = 10 : i32, message = "bqk,bkd->bqd"}> : () -> ()
    %cst_28 = arith.constant dense<0.000000e+00> : vector<1x8x8xf32>
    %65 = tpu.matmul %60, %46, %cst_28 {dimension_numbers = #tpu.dot_dimension_numbers<[2], [1], [1], [2], [0, 0, 0, 1, 1, 2], [0], [0]>} : vector<1x8x8xf32>, vector<1x8x8xf32>, vector<1x8x8xf32> -> vector<1x8x8xf32>
    "tpu.trace_stop"() : () -> ()
    %66 = vector.extract_strided_slice %13 {offsets = [0, 0, 16], sizes = [1, 8, 8], strides = [1, 1, 1]} : vector<1x8x32xf32> to vector<1x8x8xf32>
    %67 = vector.extract_strided_slice %15 {offsets = [0, 0, 16], sizes = [1, 8, 8], strides = [1, 1, 1]} : vector<1x8x32xf32> to vector<1x8x8xf32>
    %68 = vector.extract_strided_slice %17 {offsets = [0, 0, 16], sizes = [1, 8, 8], strides = [1, 1, 1]} : vector<1x8x32xf32> to vector<1x8x8xf32>
    "tpu.trace_start"() <{level = 10 : i32, message = "bqd,bkd->bqk"}> : () -> ()
    %cst_29 = arith.constant dense<0.000000e+00> : vector<1x8x8xf32>
    %69 = tpu.matmul %66, %67, %cst_29 {dimension_numbers = #tpu.dot_dimension_numbers<[2], [2], [1], [1], [0, 0, 0, 1, 1, 1], [0], [0]>} : vector<1x8x8xf32>, vector<1x8x8xf32>, vector<1x8x8xf32> -> vector<1x8x8xf32>
    %cst_30 = arith.constant -1.000000e+30 : f32
    "tpu.trace_stop"() : () -> ()
    %70 = vector.shape_cast %21 : vector<1x1x8xi1> to vector<1x1x8xi1>
    %71 = vector.broadcast %70 : vector<1x1x8xi1> to vector<1x8x8xi1>
    %72 = vector.broadcast %cst_30 : f32 to vector<1x8x8xf32>
    %73 = arith.select %71, %72, %69 : vector<1x8x8xi1>, vector<1x8x8xf32>
    %cst_31 = arith.constant dense<0xFF800000> : vector<1x8xf32>
    %74 = vector.multi_reduction <maximumf>, %73, %cst_31 [2] : vector<1x8x8xf32> to vector<1x8xf32>
    %75 = vector.shape_cast %74 : vector<1x8xf32> to vector<1x8x1xf32>
    %76 = vector.broadcast %75 : vector<1x8x1xf32> to vector<1x8x8xf32>
    %77 = arith.subf %73, %76 : vector<1x8x8xf32>
    %78 = math.exp %77 : vector<1x8x8xf32>
    %cst_32 = arith.constant dense<0.000000e+00> : vector<1x8xf32>
    %79 = vector.multi_reduction <add>, %78, %cst_32 [2] : vector<1x8x8xf32> to vector<1x8xf32>
    %80 = vector.shape_cast %79 : vector<1x8xf32> to vector<1x8x1xf32>
    %81 = vector.broadcast %80 : vector<1x8x1xf32> to vector<1x8x8xf32>
    %82 = arith.divf %78, %81 : vector<1x8x8xf32>
    %83 = arith.truncf %82 : vector<1x8x8xf32> to vector<1x8x8xbf16>
    %c0_33 = arith.constant 0 : index
    %c2 = arith.constant 2 : index
    %c0_34 = arith.constant 0 : index
    %c0_35 = arith.constant 0 : index
    %84 = vector.load %arg9[%c0_33, %c2, %c0_34, %c0_35] : memref<1x4x8x8xbf16, #tpu.memory_space<vmem>>, vector<1x1x8x8xbf16>
    %85 = vector.shape_cast %84 : vector<1x1x8x8xbf16> to vector<1x8x8xbf16>
    %86 = vector.shape_cast %83 : vector<1x8x8xbf16> to vector<1x1x8x8xbf16>
    tpu.vector_store %arg9[%c0_33, %c2, %c0_34, %c0_35], %86 {strides = array<i32>} : memref<1x4x8x8xbf16, #tpu.memory_space<vmem>>, vector<1x1x8x8xbf16>,
    "tpu.trace_start"() <{level = 10 : i32, message = "bqk,bkd->bqd"}> : () -> ()
    %cst_36 = arith.constant dense<0.000000e+00> : vector<1x8x8xf32>
    %87 = tpu.matmul %82, %68, %cst_36 {dimension_numbers = #tpu.dot_dimension_numbers<[2], [1], [1], [2], [0, 0, 0, 1, 1, 2], [0], [0]>} : vector<1x8x8xf32>, vector<1x8x8xf32>, vector<1x8x8xf32> -> vector<1x8x8xf32>
    "tpu.trace_stop"() : () -> ()
    %88 = vector.extract_strided_slice %13 {offsets = [0, 0, 24], sizes = [1, 8, 8], strides = [1, 1, 1]} : vector<1x8x32xf32> to vector<1x8x8xf32>
    %89 = vector.extract_strided_slice %15 {offsets = [0, 0, 24], sizes = [1, 8, 8], strides = [1, 1, 1]} : vector<1x8x32xf32> to vector<1x8x8xf32>
    %90 = vector.extract_strided_slice %17 {offsets = [0, 0, 24], sizes = [1, 8, 8], strides = [1, 1, 1]} : vector<1x8x32xf32> to vector<1x8x8xf32>
    "tpu.trace_start"() <{level = 10 : i32, message = "bqd,bkd->bqk"}> : () -> ()
    %cst_37 = arith.constant dense<0.000000e+00> : vector<1x8x8xf32>
    %91 = tpu.matmul %88, %89, %cst_37 {dimension_numbers = #tpu.dot_dimension_numbers<[2], [2], [1], [1], [0, 0, 0, 1, 1, 1], [0], [0]>} : vector<1x8x8xf32>, vector<1x8x8xf32>, vector<1x8x8xf32> -> vector<1x8x8xf32>
    %cst_38 = arith.constant -1.000000e+30 : f32
    "tpu.trace_stop"() : () -> ()
    %92 = vector.shape_cast %21 : vector<1x1x8xi1> to vector<1x1x8xi1>
    %93 = vector.broadcast %92 : vector<1x1x8xi1> to vector<1x8x8xi1>
    %94 = vector.broadcast %cst_38 : f32 to vector<1x8x8xf32>
    %95 = arith.select %93, %94, %91 : vector<1x8x8xi1>, vector<1x8x8xf32>
    %cst_39 = arith.constant dense<0xFF800000> : vector<1x8xf32>
    %96 = vector.multi_reduction <maximumf>, %95, %cst_39 [2] : vector<1x8x8xf32> to vector<1x8xf32>
    %97 = vector.shape_cast %96 : vector<1x8xf32> to vector<1x8x1xf32>
    %98 = vector.broadcast %97 : vector<1x8x1xf32> to vector<1x8x8xf32>
    %99 = arith.subf %95, %98 : vector<1x8x8xf32>
    %100 = math.exp %99 : vector<1x8x8xf32>
    %cst_40 = arith.constant dense<0.000000e+00> : vector<1x8xf32>
    %101 = vector.multi_reduction <add>, %100, %cst_40 [2] : vector<1x8x8xf32> to vector<1x8xf32>
    %102 = vector.shape_cast %101 : vector<1x8xf32> to vector<1x8x1xf32>
    %103 = vector.broadcast %102 : vector<1x8x1xf32> to vector<1x8x8xf32>
    %104 = arith.divf %100, %103 : vector<1x8x8xf32>
    %105 = arith.truncf %104 : vector<1x8x8xf32> to vector<1x8x8xbf16>
    %c0_41 = arith.constant 0 : index
    %c3 = arith.constant 3 : index
    %c0_42 = arith.constant 0 : index
    %c0_43 = arith.constant 0 : index
    %106 = vector.load %arg9[%c0_41, %c3, %c0_42, %c0_43] : memref<1x4x8x8xbf16, #tpu.memory_space<vmem>>, vector<1x1x8x8xbf16>
    %107 = vector.shape_cast %106 : vector<1x1x8x8xbf16> to vector<1x8x8xbf16>
    %108 = vector.shape_cast %105 : vector<1x8x8xbf16> to vector<1x1x8x8xbf16>
    tpu.vector_store %arg9[%c0_41, %c3, %c0_42, %c0_43], %108 {strides = array<i32>} : memref<1x4x8x8xbf16, #tpu.memory_space<vmem>>, vector<1x1x8x8xbf16>,
    "tpu.trace_start"() <{level = 10 : i32, message = "bqk,bkd->bqd"}> : () -> ()
    %cst_44 = arith.constant dense<0.000000e+00> : vector<1x8x8xf32>
    %109 = tpu.matmul %104, %90, %cst_44 {dimension_numbers = #tpu.dot_dimension_numbers<[2], [1], [1], [2], [0, 0, 0, 1, 1, 2], [0], [0]>} : vector<1x8x8xf32>, vector<1x8x8xf32>, vector<1x8x8xf32> -> vector<1x8x8xf32>
    "tpu.trace_stop"() : () -> ()
    %110 = tpu.concatenate %43, %65, %87, %109 in 2 : vector<1x8x8xf32>, vector<1x8x8xf32>, vector<1x8x8xf32>, vector<1x8x8xf32> -> vector<1x8x32xf32>
    %c0_45 = arith.constant 0 : index
    %c0_46 = arith.constant 0 : index
    %111 = vector.load %arg10[%c0_45, %c0_46] : memref<8x32xf32, #tpu.memory_space<vmem>>, vector<8x32xf32>
    %112 = vector.shape_cast %110 : vector<1x8x32xf32> to vector<8x32xf32>
    %c0_47 = arith.constant 0 : index
    %c0_48 = arith.constant 0 : index
    %c0_49 = arith.constant 0 : index
    %113 = vector.load %arg6[%c0_47, %c0_48, %c0_49] : memref<1x32x32xf32, #tpu.memory_space<vmem>>, vector<1x32x32xf32>
    %114 = vector.shape_cast %113 : vector<1x32x32xf32> to vector<32x32xf32>
    %cst_50 = arith.constant dense<0.000000e+00> : vector<8x32xf32>
    %115 = tpu.matmul %112, %114, %cst_50 {dimension_numbers = #tpu.dot_dimension_numbers<[1], [0], [0], [1], [0, 0, 1, 1], [], []>} : vector<8x32xf32>, vector<32x32xf32>, vector<8x32xf32> -> vector<8x32xf32>
    %116 = arith.addf %111, %115 : vector<8x32xf32>
    %c0_51 = arith.constant 0 : index
    %c0_52 = arith.constant 0 : index
    %117 = vector.load %arg10[%c0_51, %c0_52] : memref<8x32xf32, #tpu.memory_space<vmem>>, vector<8x32xf32>
    tpu.vector_store %arg10[%c0_51, %c0_52], %116 {strides = array<i32>} : memref<8x32xf32, #tpu.memory_space<vmem>>, vector<8x32xf32>,
    %c0_i32_53 = arith.constant 0 : i32
    %118 = arith.cmpi eq, %arg1, %c0_i32_53 : i32
    %119 = arith.extui %118 : i1 to i32
    %c0_i32_54 = arith.constant 0 : i32
    %120 = arith.cmpi ne, %119, %c0_i32_54 : i32
    scf.if %120 {
      %c0_55 = arith.constant 0 : index
      %c0_56 = arith.constant 0 : index
      %121 = vector.load %arg10[%c0_55, %c0_56] : memref<8x32xf32, #tpu.memory_space<vmem>>, vector<8x32xf32>
      %c0_57 = arith.constant 0 : index
      %c0_58 = arith.constant 0 : index
      %122 = vector.load %arg7[%c0_57, %c0_58] : memref<1x32xf32, #tpu.memory_space<vmem>>, vector<1x32xf32>
      %123 = vector.broadcast %122 : vector<1x32xf32> to vector<8x32xf32>
      %124 = arith.addf %121, %123 : vector<8x32xf32>
      %125 = vector.shape_cast %124 : vector<8x32xf32> to vector<1x8x32xf32>
      %c0_59 = arith.constant 0 : index
      %c0_60 = arith.constant 0 : index
      %c0_61 = arith.constant 0 : index
      %126 = vector.load %arg8[%c0_59, %c0_60, %c0_61] : memref<1x8x32xf32, #tpu.memory_space<vmem>>, vector<1x8x32xf32>
      tpu.vector_store %arg8[%c0_59, %c0_60, %c0_61], %125 {strides = array<i32>} : memref<1x8x32xf32, #tpu.memory_space<vmem>>, vector<1x8x32xf32>,
    } else {
    }
    return
  }
  func.func @transform_0(%arg0: i32, %arg1: i32) -> (i32, i32, i32) {
    %c0_i32 = arith.constant 0 : i32
    %c0_i32_0 = arith.constant 0 : i32
    %c0_i32_1 = arith.constant 0 : i32
    return %arg0, %c0_i32, %c0_i32_0 : i32, i32, i32
  }
  func.func @transform_1(%arg0: i32, %arg1: i32) -> (i32, i32, i32) {
    %c0_i32 = arith.constant 0 : i32
    %c0_i32_0 = arith.constant 0 : i32
    %c0_i32_1 = arith.constant 0 : i32
    return %arg0, %c0_i32, %c0_i32_0 : i32, i32, i32
  }
  func.func @transform_2(%arg0: i32, %arg1: i32) -> (i32, i32, i32) {
    %c0_i32 = arith.constant 0 : i32
    %c0_i32_0 = arith.constant 0 : i32
    %c0_i32_1 = arith.constant 0 : i32
    return %arg1, %c0_i32, %c0_i32_0 : i32, i32, i32
  }
  func.func @transform_3(%arg0: i32, %arg1: i32) -> (i32, i32, i32) {
    %c0_i32 = arith.constant 0 : i32
    %c0_i32_0 = arith.constant 0 : i32
    %c0_i32_1 = arith.constant 0 : i32
    return %arg1, %c0_i32, %c0_i32_0 : i32, i32, i32
  }
  func.func @transform_4(%arg0: i32, %arg1: i32) -> (i32, i32, i32) {
    %c0_i32 = arith.constant 0 : i32
    %c0_i32_0 = arith.constant 0 : i32
    %c0_i32_1 = arith.constant 0 : i32
    return %arg1, %c0_i32, %c0_i32_0 : i32, i32, i32
  }
  func.func @transform_5(%arg0: i32, %arg1: i32) -> (i32, i32) {
    %c0_i32 = arith.constant 0 : i32
    %c0_i32_0 = arith.constant 0 : i32
    %c0_i32_1 = arith.constant 0 : i32
    return %c0_i32, %c0_i32_0 : i32, i32
  }
  func.func @transform_6(%arg0: i32, %arg1: i32) -> (i32, i32, i32) {
    %c0_i32 = arith.constant 0 : i32
    %c0_i32_0 = arith.constant 0 : i32
    %c0_i32_1 = arith.constant 0 : i32
    return %arg0, %c0_i32, %c0_i32_0 : i32, i32, i32
  }
  func.func @transform_7(%arg0: i32, %arg1: i32) -> (i32, i32, i32, i32) {
    %c0_i32 = arith.constant 0 : i32
    %c0_i32_0 = arith.constant 0 : i32
    %c0_i32_1 = arith.constant 0 : i32
    return %arg0, %arg1, %c0_i32, %c0_i32_0 : i32, i32, i32, i32
  }
}

</mosaic_0001>

<bundles_post_ra>
// kernel: tpu_custom_call.1
= control target key start
LH: loop header
LB: loop body
LE: loop exit
PB: predicated region body
PF: predicated region fallthrough
CT: control target
= control target key end

     0   :  { %s1727_s0 = inlined_call_operand.hbm [shape: f32[2,8,32], index: 0, kind: input, shape index: {}]   ;;  %s1728_s1 = inlined_call_operand.vmem [shape: s32[2,1,1], index: 1, kind: input, shape index: {}]   ;;  %s1729_s2 = inlined_call_operand.hbm [shape: f32[1,32,96], index: 2, kind: input, shape index: {}]   ;;  %s1730_s3 = inlined_call_operand.vmem [shape: f32[1,1,96], index: 3, kind: input, shape index: {}]   ;;  %s1731_s4 = inlined_call_operand.hbm [shape: f32[1,32,32], index: 4, kind: input, shape index: {}]   ;;  %s1732_s5 = inlined_call_operand.vmem [shape: f32[1,32], index: 5, kind: input, shape index: {}]   ;;  %s1733_s6 = inlined_call_operand.hbm [shape: f32[2,8,32], index: 6, kind: output, shape index: {0}]   ;;  %s1734_s7 = inlined_call_operand.hbm [shape: bf16[2,4,8,8], index: 7, kind: output, shape index: {1}]  }
   0x1   :  { %1737 = sst [smem:[#allocation16_spill]] %s1727_s0 }
   0x2   :  { %1738 = sst [smem:[#allocation17_spill]] %s1729_s2 }
   0x3   :  { %13 = vsyncpa [#allocation4], 0 }
   0x4   :  { %15 = vsyncpa [#allocation4 + $0x1], 0 }
   0x5   :  { %16 = vsyncpa [#allocation7], 0 }
   0x6   :  { %17 = vsyncpa [#allocation5], 0 }
   0x7   :  { %19 = vsyncpa [#allocation5 + $0x1], 0 }
   0x8   :  { %20 = vsyncpa [#allocation11], 0 }
   0x9   :  { %22 = vsyncpa [#allocation11 + $0x1], 0  ;;  %s1469_s24 = smov 0   ;;  %s1471_s25 = smov 0  }
   0xa   :  { %s1473_s26 = smov 0   ;;  %s1475_s27 = smov 0  }
   0xb   :  { %s1477_s28 = smov 0   ;;  %s1479_s29 = smov 0  }
   0xc LB: > { %s1031_s30 = sadd.s32 4294967295, %s1406_s29   ;;  %p1033_p0 = scmp.ge.s32.totalorder %s1406_s29, 1  ;;  %s1406_s29 = sphi %s1479_s29, %s28_s29   ;;  %s1402_s28 = sphi %s1477_s28, %s1754_s28   ;;  %s1398_s27 = sphi %s1475_s27, %s1753_s27   ;;  %s1394_s26 = sphi %s1473_s26, %s1752_s26   ;;  %s1390_s25 = sphi %s1471_s25, %s1751_s25   ;;  %s1386_s24 = sphi %s1469_s24, %s1750_s24  }
   0xd   : > { %p1503_p1 = scmp.eq.s32.totalorder %s1031_s30, 0  ;;  %p250_p2 = scmp.lt.s32.totalorder %s1406_s29, 3 }
   0xe   : > { %s1740_s2 = sld [smem:[#allocation17_spill]]  ;;  %s1408_s13 = smov [#allocation6]  }
   0xf   : > { %p1511_p3 = pnand %p1033_p0, %p250_p2  ;;  %s266_s14 = sshll.u32 %s1408_s13, 4  ;;  %s267_s14 = int_to_ptr.vmem [resolvable:$true] %s266_s14 }
  0x10   : > { %p1037_p6 = scmp.ge.s32.totalorder %s1406_s29, 2  ;;  %s287_s17 = sshll.u32 %s1731_s4, 4  ;;  %s288_s17 = int_to_ptr.hbm [resolvable:$true] %s287_s17 }
  0x11   : > { %p1085_p4 = pneg %p1511_p3  ;;  %s1409_s18 = smov 128  }
  0x12   : > { %s1410_s19 = smov 8   ;;  %s1411_s20 = smov [#allocation8]  }
  0x13   : > { %p1086_p5 = pnand %p1085_p4, %p1503_p1  ;;  %s289_s21 = sshll.u32 %s1411_s20, 4  ;;  %s290_s21 = int_to_ptr.vmem [resolvable:$true] %s289_s21 }
  0x14   : > { %s264_s11 = sshll.u32 %s1740_s2, 4  ;;  %s40_s22 = sadd.s32 1, %s1402_s28  ;;  %s265_s11 = int_to_ptr.hbm [resolvable:$true] %s264_s11 }
  0x15   : > { %1088 = dma.hbm_to_vmem [thread:$0]  (!%p1086_p5), %s265_s11, 512, %s267_s14, [#allocation7], %s1409_s18, %s1409_s18, %s1410_s19  }
  0x16   : > { %1091 = dma.hbm_to_vmem [thread:$0]  (!%p1086_p5), %s288_s17, 512, %s290_s21, [#allocation7], %s1409_s18, %s1409_s18, %s1410_s19  }
  0x17   : > { %s1032_s23 = sadd.s32 4294967294, %s1406_s29   ;;  %p42_p7 = scmp.ge.s32.totalorder %s40_s22, 2 }
  0x18   : > { %s47_s9 = sadd.s32 1, %s1394_s26  ;;  %p54_p8 = scmp.ne.s32.totalorder %s1394_s26, %s1390_s25 }
  0x19   : > { %s1756_s22 = smov (%p42_p7, %s40_s22), 0  ;;  %p55_p9 = scmp.eq.s32.totalorder %s1406_s29, 0 }
  0x1a   : > { %p60_p10 = scmp.ne.s32.totalorder %s1390_s25, %s1386_s24  ;;  %s44_s10 = ssub.s32 %s1402_s28, %s1756_s22 }
  0x1b   : > { %p209_p11 = scmp.eq.s32.totalorder %s1031_s30, 1  ;;  %p45_p12 = scmp.eq.s32.totalorder %s44_s10, 0 }
  0x1c   : > { %p1539_p13 = por %p1503_p1, %p60_p10  ;;  %p215_p2 = scmp.eq.s32.totalorder %s1032_s23, 1 }
  0x1d   : > { %p1543_p0 = por %p209_p11, %p54_p8  ;;  %p56_p4 = por %p55_p9, %p54_p8 }
  0x1e   : > { %s1548_s14 = scalar_select %p45_p12, %s1394_s26, %s47_s9  }
  0x1f   : > { %p1550_p5 = por %p215_p2, %p60_p10  ;;  %s306_s16 = sand.u32 1, %s1394_s26  }
  0x20   : > { %s1039_s30 = sshll.u32 %s1402_s28, 3  ;;  %p1105_p7 = scmp.lt.s32.totalorder %s1406_s29, 2 }
  0x21   : > { %s1038_s17 = sshll.u32 %s306_s16, 3  ;;  %s1745_s0 = sld [smem:[#allocation16_spill]] }
  0x22   : > { %s310_s10 = scalar_lea.vmem [#allocation3], %s1038_s17  ;;  %p1093_p11 = pnand %p1105_p7, %p56_p4 }
  0x23   : > { %s318_s2 = sshll.u32 %s310_s10, 4  ;;  %s307_s23 = scalar_lea.sflag [#allocation4], %s306_s16  ;;  %s319_s2 = int_to_ptr.vmem [resolvable:$true] %s318_s2 }
  0x24   : > { %s1563_s9 = sand.u32 (!%p1511_p3), 1, %s1390_s25  }
  0x25   : > { %333 = sbr.rel (%p1511_p3) target bundleno = 1096 (0x448), region = 44  ;;  %s1735_s18 = sshll.u32 (!%p1511_p3), %s1563_s9, 3 }
  0x26   : > { %s339_s17 = scalar_lea.vmem (!%p1511_p3), [#allocation3], %s1735_s18 }
  0x27   : > { %s314_s20 = scalar_lea.hbm %s1745_s0, %s1039_s30  ;;  %s336_s30 = scalar_lea.sflag (!%p1511_p3), [#allocation4], %s1563_s9 }
  0x28   : > { %s316_s21 = sshll.u32 %s314_s20, 4  ;;  %s317_s21 = int_to_ptr.hbm [resolvable:$true] %s316_s21 }
  0x29   : > { %1095 = dma.hbm_to_vmem [thread:$0]  (!%p1093_p11), %s317_s21, 128, %s319_s2, %s307_s23  }
  0x2a   : > { %1369 = dma.done.wait (%p1539_p13), %s336_s30, 128  }
  0x2b   : > { %1371 = vsyncadd (%p1539_p13), %s336_s30, 4294967168 }
  0x2c   : > { %1373 = dma.done.wait (%p1503_p1), [#allocation7], 1024  }
  0x2d   : > { %1375 = vsyncadd (%p1503_p1), [#allocation7], 4294966272  ;;  %vm403_vm0 = vcmask 261120   ;;  %v1412_v0 = vmov 0.0   ;;  %v409_v1 = vld [vmem:[#allocation6 + $0x18] sm:$0xff]  ;;  %v408_v2 = vld [vmem:[#allocation6 + $0x10] sm:$0xff]  ;;  %v438_v18 = vlaneseq }
  0x2e   : > { %404 = vst.msk [vmem:[#allocation2] sm:$0xff] %vm403_vm0, %v1412_v0  ;;  %430 = vmatpush.msra.mxu0 %v409_v1  ;;  %v407_v3 = vld [vmem:[#allocation6 + $0x8] sm:$0xff]  ;;  %v406_v4 = vld [vmem:[#allocation6] sm:$0xff]  ;;  %v405_v5 = vld [vmem:[%s339_s17] sm:$0xff]  ;;  %s1413_s8 = smov 72   ;;  %s1414_s11 = smov 120  }
  0x2f   : > { %v1180_v6 = vld [vmem:[%s1730_s3] ss:$0 sm:$0xff]  ;;  %s1415_s16 = smov 96   ;;  %s1416_s19 = smov 112   ;;  %vm449_vm1 = vcmask 64512   ;;  %v1420_v11 = vmov 0  }
  0x30   : > { %431 = vmatpush.msra.mxu0 %v408_v2  ;;  %s1417_s20 = smov 80   ;;  %s1418_s21 = smov 88   ;;  %1178 = vset.pattern.permute.xlu1 %v1420_v11  ;;  %v439_v20 = vand.u32 127, %v438_v18  ;;  %vm502_vm9 = vcmask 60416  }
  0x31   : > { %s1419_s10 = smov 104   ;;  %p392_p1 = scmp.lt.s32.totalorder %s1398_s27, 1  ;;  %1179 = vset.pattern.permute.xlu0 %v1420_v11 }
  0x32   : > { %432 = vmatpush.msra.mxu0 %v407_v3  ;;  %s1736_s12 = smov 64   ;;  %s1070_s30 = sshll.u32 %s1398_s27, 4 }
  0x33   : > { %s393_s23 = scalar_select %p392_p1, %s1398_s27, 1 }
  0x34   : > { %433 = vmatpush.msra.mxu0 %v406_v4 }
  0x35   : > { %1046 = vmatmul.msk.f32.vlgmr.msra.gmra.mxu0 %vm403_vm0, %v405_v5  ;;  %s394_s2 = scalar_lea.vmem %s1728_s1, %s393_s23  ;;  %s1427_s23 = smov 24  }
  0x36   : > { %v440_v10 = vld [vmem:[%s394_s2] sm:$0x1] }
  0xb2   : > { %v435_v7 = vpop.f32.mrf.mxu0 }
  0xb3   : > { %v1582_v8 = vadd.f32 %v1180_v6, %v435_v7 }
  0xb5   : > { %696 = vrot.lane.b32.xlu2 %v1582_v8, %s1413_s8  ;;  %530 = vrot.lane.b32.xlu1 %v1582_v8, %s1414_s11  ;;  %s1422_s8 = smov 56   ;;  %s1423_s11 = smov 40  }
  0xb6   : > { %447 = vrot.lane.b32.xlu0 %v1582_v8, %s1415_s16  ;;  %s1424_s16 = smov 48  }
  0xbd   : > { %612 = vrot.lane.b32.xlu2 %v1582_v8, %s1416_s19  ;;  %614 = vrot.lane.b32.xlu1 %v1582_v8, %s1417_s20  ;;  %s1045_s19 = sshll.u32 %s1563_s9, 4 }
  0xbe   : > { %532 = vrot.lane.b32.xlu0 %v1582_v8, %s1418_s21  ;;  %s1644_s20 = scalar_lea.vmem [#allocation10], %s1045_s19  ;;  %s1425_s21 = smov 16  }
  0xbf   : > { %s867_s17 = sshll.u32 %s1644_s20, 4  ;;  %s839_s19 = scalar_lea.sflag [#allocation11], %s1563_s9  ;;  %s868_s17 = int_to_ptr.vmem [resolvable:$true] %s867_s17 }
  0xc5   : > { %442 = vperm.xlu1 %1178, %v440_v10  }
  0xc6   : > { %694 = vrot.lane.b32.xlu0 %v1582_v8, %s1419_s10  ;;  %s1426_s10 = smov 8  }
 0x10f   : > { %v697_v9 = vpop.permute.xlu2 %696 }
 0x110   : > { %1058 = vmatpush.xpose.msk.msrb.mxu0 %vm449_vm1, %v697_v9 }
 0x117   : > { %v613_v16 = vpop.permute.xlu2 %612 }
 0x127   : > { %v531_v12 = vpop.permute.xlu1 %530 }
 0x128   : > { %v448_v13 = vpop.permute.xlu0 %447 }
 0x129   : > { %1047 = vmatpush.xpose.msk.msra.mxu1 %vm449_vm1, %v448_v13 }
 0x12c   : > { %1048 = vmatmul.msk.f32.vlgmr.msra.gmra.mxu1 %vm449_vm1, %v1582_v8 }
 0x12f   : > { %v615_v14 = vpop.permute.xlu1 %614 }
 0x130   : > { %v533_v15 = vpop.permute.xlu0 %532  ;;  %1054 = vmatpush.xpose.msk.msrb.mxu1 %vm449_vm1, %v615_v14 }
 0x131   : > { %1050 = vmatpush.xpose.msk.msra.mxu3 %vm449_vm1, %v533_v15 }
 0x134   : > { %1051 = vmatmul.msk.f32.vlgmr.msra.gmra.mxu3 %vm449_vm1, %v531_v12  ;;  %1055 = vmatmul.msk.f32.vlgmr.msrb.gmra.mxu1 %vm449_vm1, %v613_v16 }
 0x137   : > { %v443_v19 = vpop.permute.xlu1 %442 }
 0x138   : > { %v695_v17 = vpop.permute.xlu0 %694  ;;  %v444_v21 = vperm.slane %v443_v19, 0 }
 0x139   : > { %1059 = vmatmul.msk.f32.vlgmr.msrb.gmra.mxu0 %vm449_vm1, %v695_v17 }
 0x13a   : > { %vm445_vm2 = vcmp.ge.s32.totalorder %v439_v20, %v444_v21 }
 0x1a9   : > { %v471_v22 = vpop.f32.mrf.mxu1 }
 0x1aa   : > { %v476_v23 = vsel %vm445_vm2, -1e+30, %v471_v22 }
 0x1ab   : > { %v477_v24 = vsel %vm449_vm1, %v476_v23, -inf }
 0x1ac   : > { %478 = vmax.xlane.f32.xlu2 %v477_v24 }
 0x1b1   : > { %v637_v25 = vpop.f32.mrf.mxu1 }
 0x1b2   : > { %v640_v26 = vsel %vm445_vm2, -1e+30, %v637_v25 }
 0x1b3   : > { %v641_v27 = vsel %vm449_vm1, %v640_v26, -inf }
 0x1b4   : > { %642 = vmax.xlane.f32.xlu1 %v641_v27 }
 0x1b6   : > { %v719_v28 = vpop.f32.mrf.mxu0 }
 0x1b7   : > { %v722_v29 = vsel %vm445_vm2, -1e+30, %v719_v28  ;;  %v555_v30 = vpop.f32.mrf.mxu3 }
 0x1b8   : > { %v558_v31 = vsel %vm445_vm2, -1e+30, %v555_v30  ;;  %v723_v32 = vsel %vm449_vm1, %v722_v29, -inf }
 0x1b9   : > { %724 = vmax.xlane.f32.xlu2 %v723_v32  ;;  %v559_v33 = vsel %vm449_vm1, %v558_v31, -inf }
 0x1ba   : > { %560 = vmax.xlane.f32.xlu0 %v559_v33 }
 0x1ce   : > { %504 = vrot.lane.b32.xlu0 %v1582_v8, %s1736_s12  ;;  %s1308_s12 = scalar_lea.hbm %s1734_s7, 32 }
 0x21f   : > { %v479_v34 = vpop.xlane.xlu2 %478 }
 0x220   : > { %v480_v35 = vsub.f32 %v476_v23, %v479_v34 }
 0x222   : > { %v481_v36 = vmul.f32 1.442695, %v480_v35 }
 0x224   : > { %1182 = vpow2.f32 %v481_v36 }
 0x227   : > { %v643_v37 = vpop.xlane.xlu1 %642 }
 0x228   : > { %v644_v38 = vsub.f32 %v640_v26, %v643_v37 }
 0x22a   : > { %v1611_v39 = vpop.eup %1182  ;;  %v645_v40 = vmul.f32 1.442695, %v644_v38 }
 0x22b   : > { %v483_v41 = vsel %vm449_vm1, %v1611_v39, 0.0 }
 0x22c   : > { %1184 = vpow2.f32 %v645_v40  ;;  %484 = vadd.xlane.f32.xlu2 %v483_v41  ;;  %v725_v42 = vpop.xlane.xlu2 %724 }
 0x22d   : > { %v726_v43 = vsub.f32 %v722_v29, %v725_v42  ;;  %v561_v44 = vpop.xlane.xlu0 %560 }
 0x22e   : > { %v562_v45 = vsub.f32 %v558_v31, %v561_v44 }
 0x22f   : > { %v727_v46 = vmul.f32 1.442695, %v726_v43 }
 0x230   : > { %v563_v47 = vmul.f32 1.442695, %v562_v45 }
 0x231   : > { %1186 = vpow2.f32 %v727_v46 }
 0x232   : > { %v1615_v48 = vpop.eup %1184  ;;  %1188 = vpow2.f32 %v563_v47 }
 0x233   : > { %v647_v49 = vsel %vm449_vm1, %v1615_v48, 0.0 }
 0x234   : > { %648 = vadd.xlane.f32.xlu1 %v647_v49 }
 0x237   : > { %v1619_v50 = vpop.eup %1186 }
 0x238   : > { %v1621_v51 = vpop.eup %1188  ;;  %v729_v52 = vsel %vm449_vm1, %v1619_v50, 0.0 }
 0x239   : > { %730 = vadd.xlane.f32.xlu2 %v729_v52  ;;  %v565_v53 = vsel %vm449_vm1, %v1621_v51, 0.0  ;;  %v796_v52 = vld [vmem:[#allocation8 + $0x10] sm:$0xff] }
 0x23a   : > { %566 = vadd.xlane.f32.xlu0 %v565_v53  ;;  %v795_v53 = vld [vmem:[#allocation8 + $0x8] sm:$0xff] }
 0x240   : > { %v505_v54 = vpop.permute.xlu0 %504 }
 0x241   : > { %525 = vmatpush.msra.mxu2 %v505_v54  ;;  %v794_v54 = vld [vmem:[#allocation8] sm:$0xff] }
 0x24d   : > { %586 = vrot.lane.b32.xlu1 %v1582_v8, %s1422_s8 }
 0x24e   : > { %750 = vrot.lane.b32.xlu0 %v1582_v8, %s1423_s11  ;;  %s866_s11 = scalar_lea.hbm %s1734_s7, %s1070_s30 }
 0x251   : > { %668 = vrot.lane.b32.xlu2 %v1582_v8, %s1424_s16  ;;  %s869_s16 = sshll.u32 %s866_s11, 4  ;;  %s870_s16 = int_to_ptr.hbm [resolvable:$true] %s869_s16 }
 0x29f   : > { %v485_v55 = vpop.xlane.xlu2 %484 }
 0x2a0   : > { %1190 = vrcp.f32 %v485_v55  ;;  %v497_v62 = vand.u32 2147483648, %v485_v55  ;;  %v495_v1 = vand.u32 2147483647, %v485_v55  ;;  %vm491_vm4 = vweird.f32 %v485_v55 }
 0x2a2   : > { %v498_v4 = vor.u32 1.1754944e-38, %v497_v62  ;;  %vm496_vm6 = vcmp.eq.f32.partialorder %v495_v1, 8.507059e+37 }
 0x2a6   : > { %v1191_v56 = vpop.eup %1190 }
 0x2a7   : > { %v487_v57 = vmul.f32 %v1191_v56, %v485_v55  ;;  %v649_v58 = vpop.xlane.xlu1 %648  ;;  %vm492_vm3 = vweird.f32 %v1191_v56 }
 0x2a8   : > { %1192 = vrcp.f32 %v649_v58  ;;  %vm493_vm5 = vmor %vm491_vm4, %vm492_vm3  ;;  %v659_v6 = vand.u32 2147483647, %v649_v58  ;;  %v661_v7 = vand.u32 2147483648, %v649_v58  ;;  %vm655_vm8 = vweird.f32 %v649_v58 }
 0x2a9   : > { %v488_v59 = vsub.f32 1.0, %v487_v57 }
 0x2aa   : > { %vm660_vm11 = vcmp.eq.f32.partialorder %v659_v6, 8.507059e+37  ;;  %v662_v19 = vor.u32 1.1754944e-38, %v661_v7 }
 0x2ab   : > { %v489_v60 = vmul.f32 %v1191_v56, %v488_v59 }
 0x2ac   : > { %v731_v61 = vpop.xlane.xlu2 %730 }
 0x2ad   : > { %1194 = vrcp.f32 %v731_v61  ;;  %v1630_v63 = vpop.xlane.xlu0 %566  ;;  %v490_v3 = vadd.f32 %v1191_v56, %v489_v60  ;;  %v741_v22 = vand.u32 2147483647, %v731_v61  ;;  %v743_v23 = vand.u32 2147483648, %v731_v61 }
 0x2ae   : > { %v1193_v0 = vpop.eup %1192  ;;  %1196 = vrcp.f32 %v1630_v63  ;;  %v579_v27 = vand.u32 2147483648, %v1630_v63  ;;  %v577_v30 = vand.u32 2147483647, %v1630_v63  ;;  %vm737_vm14 = vweird.f32 %v731_v61 }
 0x2af   : > { %v651_v2 = vmul.f32 %v1193_v0, %v649_v58  ;;  %v494_v8 = vsel %vm493_vm5, %v1191_v56, %v490_v3  ;;  %vm656_vm7 = vweird.f32 %v1193_v0  ;;  %v744_v33 = vor.u32 1.1754944e-38, %v743_v23 }
 0x2b0   : > { %v499_v11 = vsel %vm496_vm6, %v498_v4, %v494_v8  ;;  %vm1636_vm10 = vmor %vm655_vm8, %vm656_vm7  ;;  %vm573_vm2 = vweird.f32 %v1630_v63  ;;  %vm742_vm3 = vcmp.eq.f32.partialorder %v741_v22, 8.507059e+37  ;;  %v580_v37 = vor.u32 1.1754944e-38, %v579_v27 }
 0x2b1   : > { %v652_v5 = vsub.f32 1.0, %v651_v2  ;;  %v500_v14 = vmul.f32 %v1611_v39, %v499_v11  ;;  %vm578_vm5 = vcmp.eq.f32.partialorder %v577_v30, 8.507059e+37  ;;  %vm789_vm6 = vcmask 130048  }
 0x2b2   : > { %vm791_vm7 = vcmask 195584  }
 0x2b3   : > { %v1195_v9 = vpop.eup %1194  ;;  %v653_v10 = vmul.f32 %v1193_v0, %v652_v5  ;;  %v501_v21 = vpack.c.bf16 %v500_v14, %v500_v14  ;;  %1049 = vmatmul.msk.f32.vlgmr.msra.gmra.mxu2 %vm449_vm1, %v500_v14 }
 0x2b4   : > { %v1197_v12 = vpop.eup %1196  ;;  %v733_v13 = vmul.f32 %v1195_v9, %v731_v61  ;;  %v669_v15 = vpop.permute.xlu2 %668  ;;  %vm738_vm12 = vweird.f32 %v1195_v9 }
 0x2b5   : > { %v654_v16 = vadd.f32 %v1193_v0, %v653_v10  ;;  %v569_v17 = vmul.f32 %v1197_v12, %v1630_v63  ;;  %689 = vmatpush.msrb.mxu3 %v669_v15  ;;  %503 = vst.msk [vmem:[%s1644_s20] sm:$0xf] %vm502_vm9, %v501_v21  ;;  %vm574_vm13 = vweird.f32 %v1197_v12  ;;  %vm739_vm15 = vmor %vm737_vm14, %vm738_vm12 }
 0x2b6   : > { %v734_v20 = vsub.f32 1.0, %v733_v13  ;;  %vm575_vm4 = vmor %vm573_vm2, %vm574_vm13 }
 0x2b7   : > { %v570_v24 = vsub.f32 1.0, %v569_v17  ;;  %v658_v25 = vsel %vm1636_vm10, %v1193_v0, %v654_v16 }
 0x2b8   : > { %v735_v26 = vmul.f32 %v1195_v9, %v734_v20  ;;  %v663_v28 = vsel %vm660_vm11, %v662_v19, %v658_v25 }
 0x2b9   : > { %v571_v29 = vmul.f32 %v1197_v12, %v570_v24  ;;  %v664_v31 = vmul.f32 %v1615_v48, %v663_v28 }
 0x2ba   : > { %v736_v32 = vadd.f32 %v1195_v9, %v735_v26 }
 0x2bb   : > { %v572_v34 = vadd.f32 %v1197_v12, %v571_v29  ;;  %v665_v35 = vpack.c.bf16 %v664_v31, %v664_v31  ;;  %1057 = vmatmul.msk.f32.vlgmr.msrb.gmra.mxu3 %vm449_vm1, %v664_v31 }
 0x2bc   : > { %v740_v36 = vsel %vm739_vm15, %v1195_v9, %v736_v32 }
 0x2bd   : > { %v745_v38 = vsel %vm742_vm3, %v744_v33, %v740_v36  ;;  %1056 = vst.msk [vmem:[%s1644_s20 + $0x8] sm:$0xf] %vm502_vm9, %v665_v35  ;;  %v576_v39 = vsel %vm575_vm4, %v1197_v12, %v572_v34 }
 0x2be   : > { %v581_v40 = vsel %vm578_vm5, %v580_v37, %v576_v39  ;;  %v746_v41 = vmul.f32 %v1619_v50, %v745_v38 }
 0x2bf   : > { %v587_v42 = vpop.permute.xlu1 %586  ;;  %v582_v43 = vmul.f32 %v1621_v51, %v581_v40  ;;  %v797_v51 = vld [vmem:[#allocation8 + $0x18] sm:$0xff] }
 0x2c0   : > { %607 = vmatpush.msrb.mxu2 %v587_v42  ;;  %v751_v44 = vpop.permute.xlu0 %750  ;;  %v747_v45 = vpack.c.bf16 %v746_v41, %v746_v41  ;;  %813 = vmatpush.msra.mxu1 %v797_v51 }
 0x2c1   : > { %v583_v46 = vpack.c.bf16 %v582_v43, %v582_v43  ;;  %1053 = vmatmul.msk.f32.vlgmr.msrb.gmra.mxu2 %vm449_vm1, %v582_v43 }
 0x2c2   : > { %771 = vmatpush.msra.mxu2 %v751_v44  ;;  %1060 = vst.msk [vmem:[%s1644_s20 + $0xc] sm:$0xf] %vm502_vm9, %v747_v45  ;;  %814 = vmatpush.msra.mxu1 %v796_v52 }
 0x2c3   : > { %1052 = vst.msk [vmem:[%s1644_s20 + $0x4] sm:$0xf] %vm502_vm9, %v583_v46 }
 0x2c4   : > { %815 = vmatpush.msra.mxu1 %v795_v53 }
 0x2c6   : > { %816 = vmatpush.msra.mxu1 %v794_v54 }
 0x2c9   : > { %1061 = vmatmul.msk.f32.vlgmr.msra.gmra.mxu2 %vm449_vm1, %v746_v41 }
 0x336   : > { %v527_v47 = vpop.f32.mrf.mxu2 }
 0x33e   : > { %v691_v48 = vpop.f32.mrf.mxu3 }
 0x33f   : > { %781 = vrot.lane.b32.xlu0 %v691_v48, %s1425_s21  ;;  %s1302_s21 = sshra.s32 %s870_s16, 4  ;;  %s1303_s21 = int_to_ptr.hbm [resolvable:$true] %s1302_s21 }
 0x340   : > { %p1309_p10 = scmp.lt.s32.totalorder %s1303_s21, %s1734_s7 }
 0x344   : > { %v609_v49 = vpop.f32.mrf.mxu2 }
 0x345   : > { %777 = vrot.lane.b32.xlu1 %v609_v49, %s1426_s10  ;;  %s1304_s10 = scalar_lea.hbm %s1303_s21, 16 }
 0x346   : > { %p1305_p3 = scmp.ne.s32.totalorder %s1303_s21, %s1304_s10  ;;  %p1310_p12 = scmp.lt.s32.totalorder %s1308_s12, %s1304_s10 }
 0x348   : > { %p1306_p8 = pnand %p1305_p3, %p1543_p0  ;;  %p1311_p13 = por %p1310_p12, %p1309_p10 }
 0x34a   : > { %p1307_p9 = pneg %p1306_p8 }
 0x34c   : > { %v773_v50 = vpop.f32.mrf.mxu2  ;;  %p1312_p2 = pnand %p1311_p13, %p1307_p9 }
 0x34d   : > { %785 = vrot.lane.b32.xlu2 %v773_v50, %s1427_s23 }
 0x3a7   : > { %v786_v58 = vpop.permute.xlu2 %785 }
 0x3b1   : > { %v782_v56 = vpop.permute.xlu0 %781 }
 0x3b7   : > { %v778_v55 = vpop.permute.xlu1 %777 }
 0x3b8   : > { %v788_v57 = vsel %vm449_vm1, %v527_v47, %v778_v55 }
 0x3b9   : > { %v790_v59 = vsel %vm789_vm6, %v788_v57, %v782_v56 }
 0x3ba   : > { %v792_v60 = vsel %vm791_vm7, %v790_v59, %v786_v58 }
 0x3bb   : > { %1062 = vmatmul.msk.f32.vlgmr.msra.gmra.mxu1 %vm403_vm0, %v792_v60 }
 0x3bc   : > { %1315 = shalt.err (!%p1312_p2)
}
 0x3bd   : > { %s1428_s30 = smov 4   ;;  %s1748_s2 = smov 64   ;;  %v793_v61 = vld [vmem:[#allocation2] sm:$0xff] }
 0x3be   : > { %1082 = dma.vmem_to_hbm [thread:$0]  (%p1543_p0), %s868_s17, 256, %s870_s16, %s839_s19, %s1748_s2, %s1748_s2, %s1428_s30  }
 0x3bf   : > { %s1065_s18 = sshll.u32 %s1398_s27, 3  ;;  %v1181_v0 = vld [vmem:[%s1732_s5] ss:$0 sm:$0xff]  ;;  %s1749_s10 = sshll.u32 %s1563_s9, 3 }
 0x3c0   : > { %s849_s8 = scalar_lea.hbm %s1733_s6, %s1065_s18  ;;  %s384_s23 = scalar_lea.vmem [#allocation9], %s1749_s10 }
 0x3c1   : > { %s851_s20 = sshll.u32 %s384_s23, 4  ;;  %s853_s17 = sshll.u32 %s849_s8, 4  ;;  %s852_s20 = int_to_ptr.vmem [resolvable:$true] %s851_s20  ;;  %s854_s17 = int_to_ptr.hbm [resolvable:$true] %s853_s17 }
 0x3c2   : > { %s834_s27 = scalar_lea.sflag [#allocation5], %s1563_s9  ;;  %s1330_s16 = sshra.s32 %s854_s17, 4  ;;  %s1331_s16 = int_to_ptr.hbm [resolvable:$true] %s1330_s16 }
 0x3c3   : > { %s1332_s19 = scalar_lea.hbm %s1331_s16, 8  ;;  %s1336_s18 = scalar_lea.hbm %s1733_s6, 16 }
 0x3c4   : > { %p1333_p4 = scmp.ne.s32.totalorder %s1331_s16, %s1332_s19  ;;  %p1337_p1 = scmp.lt.s32.totalorder %s1331_s16, %s1733_s6 }
 0x3c5   : > { %p1338_p3 = scmp.lt.s32.totalorder %s1336_s18, %s1332_s19 }
 0x3c6   : > { %p1334_p7 = pnand %p1333_p4, %p1543_p0 }
 0x3c7   : > { %p1339_p8 = por %p1338_p3, %p1337_p1 }
 0x3c8   : > { %p1335_p11 = pneg %p1334_p7 }
 0x3ca   : > { %p1340_p9 = pnand %p1339_p8, %p1335_p11 }
 0x438   : > { %v818_v62 = vpop.f32.mrf.mxu1 }
 0x439   : > { %v821_v63 = vadd.f32 %v818_v62, %v793_v61 }
 0x43b   : > { %822 = vst.msk [vmem:[#allocation2] sm:$0xff] %vm403_vm0, %v821_v63 }
 0x442   : > { %v826_v1 = vld [vmem:[#allocation2] sm:$0xff] }
 0x443   : > { %v831_v2 = vadd.f32 %v1181_v0, %v826_v1 }
 0x445   : > { %832 = vst.msk [vmem:[%s384_s23] sm:$0xff] %vm403_vm0, %v831_v2 }
 0x446   : > { %1343 = shalt.err (!%p1340_p9)
}
 0x447   : > { %1081 = dma.vmem_to_hbm [thread:$0]  (%p1543_p0), %s852_s20, 128, %s854_s17, %s834_s27  }
 0x448 PF: > { %s884_s9 = sand.u32 1, %s1386_s24   ;;  %p1097_p10 = pnand %p1037_p6, %p1550_p5 }
 0x449   : > { %s885_s8 = scalar_lea.sflag [#allocation5], %s884_s9 }
 0x44a   : > { %p1098_p12 = pneg %p1097_p10 }
 0x44c   : > { %1377 = dma.done.wait (%p1098_p12), %s885_s8, 128  }
 0x44d   : > { %1379 = vsyncadd (%p1098_p12), %s885_s8, 4294967168  ;;  %s895_s11 = scalar_lea.sflag [#allocation11], %s884_s9 }
 0x44e   : > { %1381 = dma.done.wait (%p1098_p12), %s895_s11, 256  }
 0x44f   : > { %1383 = vsyncadd (%p1098_p12), %s895_s11, 4294967040  ;;  %s28_s29 = sadd.s32 1, %s1406_s29   ;;  %s1750_s24 = smov %s1390_s25 }
 0x450   : > { %p25_p13 = scmp.ge.s32.totalorder %s28_s29, 4   ;;  %s1751_s25 = smov %s1394_s26 }
 0x451   : > { %s1752_s26 = smov %s1548_s14  ;;  %s1753_s27 = smov %s1402_s28 }
 0x452   : > { %s1754_s28 = smov %s1756_s22  ;;  %27 = sbr.rel (!%p25_p13) target bundleno = 12 (0xc), region = 133 }
 0x457   :  { %901 = vsyncpa [#allocation4], 1 }
 0x458   :  { %903 = vsyncpa [#allocation4 + $0x1], 1 }
 0x459   :  { %904 = vsyncpa [#allocation7], 1 }
 0x45a   :  { %905 = vsyncpa [#allocation5], 1 }
 0x45b   :  { %907 = vsyncpa [#allocation5 + $0x1], 1 }
 0x45c   :  { %908 = vsyncpa [#allocation11], 1 }
 0x45d   :  { %910 = vsyncpa [#allocation11 + $0x1], 1 }

// kernel: tpu_custom_call.1
= control target key start
LH: loop header
LB: loop body
LE: loop exit
PB: predicated region body
PF: predicated region fallthrough
CT: control target
= control target key end

     0   :  { %s1727_s0 = inlined_call_operand.hbm [shape: f32[2,8,32], index: 0, kind: input, shape index: {}]   ;;  %s1728_s1 = inlined_call_operand.vmem [shape: s32[2,1,1], index: 1, kind: input, shape index: {}]   ;;  %s1729_s2 = inlined_call_operand.hbm [shape: f32[1,32,96], index: 2, kind: input, shape index: {}]   ;;  %s1730_s3 = inlined_call_operand.vmem [shape: f32[1,1,96], index: 3, kind: input, shape index: {}]   ;;  %s1731_s4 = inlined_call_operand.hbm [shape: f32[1,32,32], index: 4, kind: input, shape index: {}]   ;;  %s1732_s5 = inlined_call_operand.vmem [shape: f32[1,32], index: 5, kind: input, shape index: {}]   ;;  %s1733_s6 = inlined_call_operand.hbm [shape: f32[2,8,32], index: 6, kind: output, shape index: {0}]   ;;  %s1734_s7 = inlined_call_operand.hbm [shape: bf16[2,4,8,8], index: 7, kind: output, shape index: {1}]  }
   0x1   :  { %1737 = sst [smem:[#allocation16_spill]] %s1727_s0 }
   0x2   :  { %1738 = sst [smem:[#allocation17_spill]] %s1729_s2 }
   0x3   :  { %13 = vsyncpa [#allocation4], 0 }
   0x4   :  { %15 = vsyncpa [#allocation4 + $0x1], 0 }
   0x5   :  { %16 = vsyncpa [#allocation7], 0 }
   0x6   :  { %17 = vsyncpa [#allocation5], 0 }
   0x7   :  { %19 = vsyncpa [#allocation5 + $0x1], 0 }
   0x8   :  { %20 = vsyncpa [#allocation11], 0 }
   0x9   :  { %22 = vsyncpa [#allocation11 + $0x1], 0  ;;  %s1469_s24 = smov 0   ;;  %s1471_s25 = smov 0  }
   0xa   :  { %s1473_s26 = smov 0   ;;  %s1475_s27 = smov 0  }
   0xb   :  { %s1477_s28 = smov 0   ;;  %s1479_s29 = smov 0  }
   0xc LB: > { %s1031_s30 = sadd.s32 4294967295, %s1406_s29   ;;  %p1033_p0 = scmp.ge.s32.totalorder %s1406_s29, 1  ;;  %s1406_s29 = sphi %s1479_s29, %s28_s29   ;;  %s1402_s28 = sphi %s1477_s28, %s1754_s28   ;;  %s1398_s27 = sphi %s1475_s27, %s1753_s27   ;;  %s1394_s26 = sphi %s1473_s26, %s1752_s26   ;;  %s1390_s25 = sphi %s1471_s25, %s1751_s25   ;;  %s1386_s24 = sphi %s1469_s24, %s1750_s24  }
   0xd   : > { %p1503_p1 = scmp.eq.s32.totalorder %s1031_s30, 0  ;;  %p250_p2 = scmp.lt.s32.totalorder %s1406_s29, 3 }
   0xe   : > { %s1740_s2 = sld [smem:[#allocation17_spill]]  ;;  %s1408_s13 = smov [#allocation6]  }
   0xf   : > { %p1511_p3 = pnand %p1033_p0, %p250_p2  ;;  %s266_s14 = sshll.u32 %s1408_s13, 4  ;;  %s267_s14 = int_to_ptr.vmem [resolvable:$true] %s266_s14 }
  0x10   : > { %p1037_p6 = scmp.ge.s32.totalorder %s1406_s29, 2  ;;  %s287_s17 = sshll.u32 %s1731_s4, 4  ;;  %s288_s17 = int_to_ptr.hbm [resolvable:$true] %s287_s17 }
  0x11   : > { %p1085_p4 = pneg %p1511_p3  ;;  %s1409_s18 = smov 128  }
  0x12   : > { %s1410_s19 = smov 8   ;;  %s1411_s20 = smov [#allocation8]  }
  0x13   : > { %p1086_p5 = pnand %p1085_p4, %p1503_p1  ;;  %s289_s21 = sshll.u32 %s1411_s20, 4  ;;  %s290_s21 = int_to_ptr.vmem [resolvable:$true] %s289_s21 }
  0x14   : > { %s264_s11 = sshll.u32 %s1740_s2, 4  ;;  %s40_s22 = sadd.s32 1, %s1402_s28  ;;  %s265_s11 = int_to_ptr.hbm [resolvable:$true] %s264_s11 }
  0x15   : > { %1088 = dma.hbm_to_vmem [thread:$0]  (!%p1086_p5), %s265_s11, 512, %s267_s14, [#allocation7], %s1409_s18, %s1409_s18, %s1410_s19  }
  0x16   : > { %1091 = dma.hbm_to_vmem [thread:$0]  (!%p1086_p5), %s288_s17, 512, %s290_s21, [#allocation7], %s1409_s18, %s1409_s18, %s1410_s19  }
  0x17   : > { %s1032_s23 = sadd.s32 4294967294, %s1406_s29   ;;  %p42_p7 = scmp.ge.s32.totalorder %s40_s22, 2 }
  0x18   : > { %s47_s9 = sadd.s32 1, %s1394_s26  ;;  %p54_p8 = scmp.ne.s32.totalorder %s1394_s26, %s1390_s25 }
  0x19   : > { %s1756_s22 = smov (%p42_p7, %s40_s22), 0  ;;  %p55_p9 = scmp.eq.s32.totalorder %s1406_s29, 0 }
  0x1a   : > { %p60_p10 = scmp.ne.s32.totalorder %s1390_s25, %s1386_s24  ;;  %s44_s10 = ssub.s32 %s1402_s28, %s1756_s22 }
  0x1b   : > { %p209_p11 = scmp.eq.s32.totalorder %s1031_s30, 1  ;;  %p45_p12 = scmp.eq.s32.totalorder %s44_s10, 0 }
  0x1c   : > { %p1539_p13 = por %p1503_p1, %p60_p10  ;;  %p215_p2 = scmp.eq.s32.totalorder %s1032_s23, 1 }
  0x1d   : > { %p1543_p0 = por %p209_p11, %p54_p8  ;;  %p56_p4 = por %p55_p9, %p54_p8 }
  0x1e   : > { %s1548_s14 = scalar_select %p45_p12, %s1394_s26, %s47_s9  }
  0x1f   : > { %p1550_p5 = por %p215_p2, %p60_p10  ;;  %s306_s16 = sand.u32 1, %s1394_s26  }
  0x20   : > { %s1039_s30 = sshll.u32 %s1402_s28, 3  ;;  %p1105_p7 = scmp.lt.s32.totalorder %s1406_s29, 2 }
  0x21   : > { %s1038_s17 = sshll.u32 %s306_s16, 3  ;;  %s1745_s0 = sld [smem:[#allocation16_spill]] }
  0x22   : > { %s310_s10 = scalar_lea.vmem [#allocation3], %s1038_s17  ;;  %p1093_p11 = pnand %p1105_p7, %p56_p4 }
  0x23   : > { %s318_s2 = sshll.u32 %s310_s10, 4  ;;  %s307_s23 = scalar_lea.sflag [#allocation4], %s306_s16  ;;  %s319_s2 = int_to_ptr.vmem [resolvable:$true] %s318_s2 }
  0x24   : > { %s1563_s9 = sand.u32 (!%p1511_p3), 1, %s1390_s25  }
  0x25   : > { %333 = sbr.rel (%p1511_p3) target bundleno = 1096 (0x448), region = 44  ;;  %s1735_s18 = sshll.u32 (!%p1511_p3), %s1563_s9, 3 }
  0x26   : > { %s339_s17 = scalar_lea.vmem (!%p1511_p3), [#allocation3], %s1735_s18 }
  0x27   : > { %s314_s20 = scalar_lea.hbm %s1745_s0, %s1039_s30  ;;  %s336_s30 = scalar_lea.sflag (!%p1511_p3), [#allocation4], %s1563_s9 }
  0x28   : > { %s316_s21 = sshll.u32 %s314_s20, 4  ;;  %s317_s21 = int_to_ptr.hbm [resolvable:$true] %s316_s21 }
  0x29   : > { %1095 = dma.hbm_to_vmem [thread:$0]  (!%p1093_p11), %s317_s21, 128, %s319_s2, %s307_s23  }
  0x2a   : > { %1369 = dma.done.wait (%p1539_p13), %s336_s30, 128  }
  0x2b   : > { %1371 = vsyncadd (%p1539_p13), %s336_s30, 4294967168 }
  0x2c   : > { %1373 = dma.done.wait (%p1503_p1), [#allocation7], 1024  }
  0x2d   : > { %1375 = vsyncadd (%p1503_p1), [#allocation7], 4294966272  ;;  %vm403_vm0 = vcmask 261120   ;;  %v1412_v0 = vmov 0.0   ;;  %v409_v1 = vld [vmem:[#allocation6 + $0x18] sm:$0xff]  ;;  %v408_v2 = vld [vmem:[#allocation6 + $0x10] sm:$0xff]  ;;  %v438_v18 = vlaneseq }
  0x2e   : > { %404 = vst.msk [vmem:[#allocation2] sm:$0xff] %vm403_vm0, %v1412_v0  ;;  %430 = vmatpush.msra.mxu0 %v409_v1  ;;  %v407_v3 = vld [vmem:[#allocation6 + $0x8] sm:$0xff]  ;;  %v406_v4 = vld [vmem:[#allocation6] sm:$0xff]  ;;  %v405_v5 = vld [vmem:[%s339_s17] sm:$0xff]  ;;  %s1413_s8 = smov 72   ;;  %s1414_s11 = smov 120  }
  0x2f   : > { %v1180_v6 = vld [vmem:[%s1730_s3] ss:$0 sm:$0xff]  ;;  %s1415_s16 = smov 96   ;;  %s1416_s19 = smov 112   ;;  %vm449_vm1 = vcmask 64512   ;;  %v1420_v11 = vmov 0  }
  0x30   : > { %431 = vmatpush.msra.mxu0 %v408_v2  ;;  %s1417_s20 = smov 80   ;;  %s1418_s21 = smov 88   ;;  %1178 = vset.pattern.permute.xlu1 %v1420_v11  ;;  %v439_v20 = vand.u32 127, %v438_v18  ;;  %vm502_vm9 = vcmask 60416  }
  0x31   : > { %s1419_s10 = smov 104   ;;  %p392_p1 = scmp.lt.s32.totalorder %s1398_s27, 1  ;;  %1179 = vset.pattern.permute.xlu0 %v1420_v11 }
  0x32   : > { %432 = vmatpush.msra.mxu0 %v407_v3  ;;  %s1736_s12 = smov 64   ;;  %s1070_s30 = sshll.u32 %s1398_s27, 4 }
  0x33   : > { %s393_s23 = scalar_select %p392_p1, %s1398_s27, 1 }
  0x34   : > { %433 = vmatpush.msra.mxu0 %v406_v4 }
  0x35   : > { %1046 = vmatmul.msk.f32.vlgmr.msra.gmra.mxu0 %vm403_vm0, %v405_v5  ;;  %s394_s2 = scalar_lea.vmem %s1728_s1, %s393_s23  ;;  %s1427_s23 = smov 24  }
  0x36   : > { %v440_v10 = vld [vmem:[%s394_s2] sm:$0x1] }
  0xb2   : > { %v435_v7 = vpop.f32.mrf.mxu0 }
  0xb3   : > { %v1582_v8 = vadd.f32 %v1180_v6, %v435_v7 }
  0xb5   : > { %696 = vrot.lane.b32.xlu2 %v1582_v8, %s1413_s8  ;;  %530 = vrot.lane.b32.xlu1 %v1582_v8, %s1414_s11  ;;  %s1422_s8 = smov 56   ;;  %s1423_s11 = smov 40  }
  0xb6   : > { %447 = vrot.lane.b32.xlu0 %v1582_v8, %s1415_s16  ;;  %s1424_s16 = smov 48  }
  0xbd   : > { %612 = vrot.lane.b32.xlu2 %v1582_v8, %s1416_s19  ;;  %614 = vrot.lane.b32.xlu1 %v1582_v8, %s1417_s20  ;;  %s1045_s19 = sshll.u32 %s1563_s9, 4 }
  0xbe   : > { %532 = vrot.lane.b32.xlu0 %v1582_v8, %s1418_s21  ;;  %s1644_s20 = scalar_lea.vmem [#allocation10], %s1045_s19  ;;  %s1425_s21 = smov 16  }
  0xbf   : > { %s867_s17 = sshll.u32 %s1644_s20, 4  ;;  %s839_s19 = scalar_lea.sflag [#allocation11], %s1563_s9  ;;  %s868_s17 = int_to_ptr.vmem [resolvable:$true] %s867_s17 }
  0xc5   : > { %442 = vperm.xlu1 %1178, %v440_v10  }
  0xc6   : > { %694 = vrot.lane.b32.xlu0 %v1582_v8, %s1419_s10  ;;  %s1426_s10 = smov 8  }
 0x10f   : > { %v697_v9 = vpop.permute.xlu2 %696 }
 0x110   : > { %1058 = vmatpush.xpose.msk.msrb.mxu0 %vm449_vm1, %v697_v9 }
 0x117   : > { %v613_v16 = vpop.permute.xlu2 %612 }
 0x127   : > { %v531_v12 = vpop.permute.xlu1 %530 }
 0x128   : > { %v448_v13 = vpop.permute.xlu0 %447 }
 0x129   : > { %1047 = vmatpush.xpose.msk.msra.mxu1 %vm449_vm1, %v448_v13 }
 0x12c   : > { %1048 = vmatmul.msk.f32.vlgmr.msra.gmra.mxu1 %vm449_vm1, %v1582_v8 }
 0x12f   : > { %v615_v14 = vpop.permute.xlu1 %614 }
 0x130   : > { %v533_v15 = vpop.permute.xlu0 %532  ;;  %1054 = vmatpush.xpose.msk.msrb.mxu1 %vm449_vm1, %v615_v14 }
 0x131   : > { %1050 = vmatpush.xpose.msk.msra.mxu3 %vm449_vm1, %v533_v15 }
 0x134   : > { %1051 = vmatmul.msk.f32.vlgmr.msra.gmra.mxu3 %vm449_vm1, %v531_v12  ;;  %1055 = vmatmul.msk.f32.vlgmr.msrb.gmra.mxu1 %vm449_vm1, %v613_v16 }
 0x137   : > { %v443_v19 = vpop.permute.xlu1 %442 }
 0x138   : > { %v695_v17 = vpop.permute.xlu0 %694  ;;  %v444_v21 = vperm.slane %v443_v19, 0 }
 0x139   : > { %1059 = vmatmul.msk.f32.vlgmr.msrb.gmra.mxu0 %vm449_vm1, %v695_v17 }
 0x13a   : > { %vm445_vm2 = vcmp.ge.s32.totalorder %v439_v20, %v444_v21 }
 0x1a9   : > { %v471_v22 = vpop.f32.mrf.mxu1 }
 0x1aa   : > { %v476_v23 = vsel %vm445_vm2, -1e+30, %v471_v22 }
 0x1ab   : > { %v477_v24 = vsel %vm449_vm1, %v476_v23, -inf }
 0x1ac   : > { %478 = vmax.xlane.f32.xlu2 %v477_v24 }
 0x1b1   : > { %v637_v25 = vpop.f32.mrf.mxu1 }
 0x1b2   : > { %v640_v26 = vsel %vm445_vm2, -1e+30, %v637_v25 }
 0x1b3   : > { %v641_v27 = vsel %vm449_vm1, %v640_v26, -inf }
 0x1b4   : > { %642 = vmax.xlane.f32.xlu1 %v641_v27 }
 0x1b6   : > { %v719_v28 = vpop.f32.mrf.mxu0 }
 0x1b7   : > { %v722_v29 = vsel %vm445_vm2, -1e+30, %v719_v28  ;;  %v555_v30 = vpop.f32.mrf.mxu3 }
 0x1b8   : > { %v558_v31 = vsel %vm445_vm2, -1e+30, %v555_v30  ;;  %v723_v32 = vsel %vm449_vm1, %v722_v29, -inf }
 0x1b9   : > { %724 = vmax.xlane.f32.xlu2 %v723_v32  ;;  %v559_v33 = vsel %vm449_vm1, %v558_v31, -inf }
 0x1ba   : > { %560 = vmax.xlane.f32.xlu0 %v559_v33 }
 0x1ce   : > { %504 = vrot.lane.b32.xlu0 %v1582_v8, %s1736_s12  ;;  %s1308_s12 = scalar_lea.hbm %s1734_s7, 32 }
 0x21f   : > { %v479_v34 = vpop.xlane.xlu2 %478 }
 0x220   : > { %v480_v35 = vsub.f32 %v476_v23, %v479_v34 }
 0x222   : > { %v481_v36 = vmul.f32 1.442695, %v480_v35 }
 0x224   : > { %1182 = vpow2.f32 %v481_v36 }
 0x227   : > { %v643_v37 = vpop.xlane.xlu1 %642 }
 0x228   : > { %v644_v38 = vsub.f32 %v640_v26, %v643_v37 }
 0x22a   : > { %v1611_v39 = vpop.eup %1182  ;;  %v645_v40 = vmul.f32 1.442695, %v644_v38 }
 0x22b   : > { %v483_v41 = vsel %vm449_vm1, %v1611_v39, 0.0 }
 0x22c   : > { %1184 = vpow2.f32 %v645_v40  ;;  %484 = vadd.xlane.f32.xlu2 %v483_v41  ;;  %v725_v42 = vpop.xlane.xlu2 %724 }
 0x22d   : > { %v726_v43 = vsub.f32 %v722_v29, %v725_v42  ;;  %v561_v44 = vpop.xlane.xlu0 %560 }
 0x22e   : > { %v562_v45 = vsub.f32 %v558_v31, %v561_v44 }
 0x22f   : > { %v727_v46 = vmul.f32 1.442695, %v726_v43 }
 0x230   : > { %v563_v47 = vmul.f32 1.442695, %v562_v45 }
 0x231   : > { %1186 = vpow2.f32 %v727_v46 }
 0x232   : > { %v1615_v48 = vpop.eup %1184  ;;  %1188 = vpow2.f32 %v563_v47 }
 0x233   : > { %v647_v49 = vsel %vm449_vm1, %v1615_v48, 0.0 }
 0x234   : > { %648 = vadd.xlane.f32.xlu1 %v647_v49 }
 0x237   : > { %v1619_v50 = vpop.eup %1186 }
 0x238   : > { %v1621_v51 = vpop.eup %1188  ;;  %v729_v52 = vsel %vm449_vm1, %v1619_v50, 0.0 }
 0x239   : > { %730 = vadd.xlane.f32.xlu2 %v729_v52  ;;  %v565_v53 = vsel %vm449_vm1, %v1621_v51, 0.0  ;;  %v796_v52 = vld [vmem:[#allocation8 + $0x10] sm:$0xff] }
 0x23a   : > { %566 = vadd.xlane.f32.xlu0 %v565_v53  ;;  %v795_v53 = vld [vmem:[#allocation8 + $0x8] sm:$0xff] }
 0x240   : > { %v505_v54 = vpop.permute.xlu0 %504 }
 0x241   : > { %525 = vmatpush.msra.mxu2 %v505_v54  ;;  %v794_v54 = vld [vmem:[#allocation8] sm:$0xff] }
 0x24d   : > { %586 = vrot.lane.b32.xlu1 %v1582_v8, %s1422_s8 }
 0x24e   : > { %750 = vrot.lane.b32.xlu0 %v1582_v8, %s1423_s11  ;;  %s866_s11 = scalar_lea.hbm %s1734_s7, %s1070_s30 }
 0x251   : > { %668 = vrot.lane.b32.xlu2 %v1582_v8, %s1424_s16  ;;  %s869_s16 = sshll.u32 %s866_s11, 4  ;;  %s870_s16 = int_to_ptr.hbm [resolvable:$true] %s869_s16 }
 0x29f   : > { %v485_v55 = vpop.xlane.xlu2 %484 }
 0x2a0   : > { %1190 = vrcp.f32 %v485_v55  ;;  %v497_v62 = vand.u32 2147483648, %v485_v55  ;;  %v495_v1 = vand.u32 2147483647, %v485_v55  ;;  %vm491_vm4 = vweird.f32 %v485_v55 }
 0x2a2   : > { %v498_v4 = vor.u32 1.1754944e-38, %v497_v62  ;;  %vm496_vm6 = vcmp.eq.f32.partialorder %v495_v1, 8.507059e+37 }
 0x2a6   : > { %v1191_v56 = vpop.eup %1190 }
 0x2a7   : > { %v487_v57 = vmul.f32 %v1191_v56, %v485_v55  ;;  %v649_v58 = vpop.xlane.xlu1 %648  ;;  %vm492_vm3 = vweird.f32 %v1191_v56 }
 0x2a8   : > { %1192 = vrcp.f32 %v649_v58  ;;  %vm493_vm5 = vmor %vm491_vm4, %vm492_vm3  ;;  %v659_v6 = vand.u32 2147483647, %v649_v58  ;;  %v661_v7 = vand.u32 2147483648, %v649_v58  ;;  %vm655_vm8 = vweird.f32 %v649_v58 }
 0x2a9   : > { %v488_v59 = vsub.f32 1.0, %v487_v57 }
 0x2aa   : > { %vm660_vm11 = vcmp.eq.f32.partialorder %v659_v6, 8.507059e+37  ;;  %v662_v19 = vor.u32 1.1754944e-38, %v661_v7 }
 0x2ab   : > { %v489_v60 = vmul.f32 %v1191_v56, %v488_v59 }
 0x2ac   : > { %v731_v61 = vpop.xlane.xlu2 %730 }
 0x2ad   : > { %1194 = vrcp.f32 %v731_v61  ;;  %v1630_v63 = vpop.xlane.xlu0 %566  ;;  %v490_v3 = vadd.f32 %v1191_v56, %v489_v60  ;;  %v741_v22 = vand.u32 2147483647, %v731_v61  ;;  %v743_v23 = vand.u32 2147483648, %v731_v61 }
 0x2ae   : > { %v1193_v0 = vpop.eup %1192  ;;  %1196 = vrcp.f32 %v1630_v63  ;;  %v579_v27 = vand.u32 2147483648, %v1630_v63  ;;  %v577_v30 = vand.u32 2147483647, %v1630_v63  ;;  %vm737_vm14 = vweird.f32 %v731_v61 }
 0x2af   : > { %v651_v2 = vmul.f32 %v1193_v0, %v649_v58  ;;  %v494_v8 = vsel %vm493_vm5, %v1191_v56, %v490_v3  ;;  %vm656_vm7 = vweird.f32 %v1193_v0  ;;  %v744_v33 = vor.u32 1.1754944e-38, %v743_v23 }
 0x2b0   : > { %v499_v11 = vsel %vm496_vm6, %v498_v4, %v494_v8  ;;  %vm1636_vm10 = vmor %vm655_vm8, %vm656_vm7  ;;  %vm573_vm2 = vweird.f32 %v1630_v63  ;;  %vm742_vm3 = vcmp.eq.f32.partialorder %v741_v22, 8.507059e+37  ;;  %v580_v37 = vor.u32 1.1754944e-38, %v579_v27 }
 0x2b1   : > { %v652_v5 = vsub.f32 1.0, %v651_v2  ;;  %v500_v14 = vmul.f32 %v1611_v39, %v499_v11  ;;  %vm578_vm5 = vcmp.eq.f32.partialorder %v577_v30, 8.507059e+37  ;;  %vm789_vm6 = vcmask 130048  }
 0x2b2   : > { %vm791_vm7 = vcmask 195584  }
 0x2b3   : > { %v1195_v9 = vpop.eup %1194  ;;  %v653_v10 = vmul.f32 %v1193_v0, %v652_v5  ;;  %v501_v21 = vpack.c.bf16 %v500_v14, %v500_v14  ;;  %1049 = vmatmul.msk.f32.vlgmr.msra.gmra.mxu2 %vm449_vm1, %v500_v14 }
 0x2b4   : > { %v1197_v12 = vpop.eup %1196  ;;  %v733_v13 = vmul.f32 %v1195_v9, %v731_v61  ;;  %v669_v15 = vpop.permute.xlu2 %668  ;;  %vm738_vm12 = vweird.f32 %v1195_v9 }
 0x2b5   : > { %v654_v16 = vadd.f32 %v1193_v0, %v653_v10  ;;  %v569_v17 = vmul.f32 %v1197_v12, %v1630_v63  ;;  %689 = vmatpush.msrb.mxu3 %v669_v15  ;;  %503 = vst.msk [vmem:[%s1644_s20] sm:$0xf] %vm502_vm9, %v501_v21  ;;  %vm574_vm13 = vweird.f32 %v1197_v12  ;;  %vm739_vm15 = vmor %vm737_vm14, %vm738_vm12 }
 0x2b6   : > { %v734_v20 = vsub.f32 1.0, %v733_v13  ;;  %vm575_vm4 = vmor %vm573_vm2, %vm574_vm13 }
 0x2b7   : > { %v570_v24 = vsub.f32 1.0, %v569_v17  ;;  %v658_v25 = vsel %vm1636_vm10, %v1193_v0, %v654_v16 }
 0x2b8   : > { %v735_v26 = vmul.f32 %v1195_v9, %v734_v20  ;;  %v663_v28 = vsel %vm660_vm11, %v662_v19, %v658_v25 }
 0x2b9   : > { %v571_v29 = vmul.f32 %v1197_v12, %v570_v24  ;;  %v664_v31 = vmul.f32 %v1615_v48, %v663_v28 }
 0x2ba   : > { %v736_v32 = vadd.f32 %v1195_v9, %v735_v26 }
 0x2bb   : > { %v572_v34 = vadd.f32 %v1197_v12, %v571_v29  ;;  %v665_v35 = vpack.c.bf16 %v664_v31, %v664_v31  ;;  %1057 = vmatmul.msk.f32.vlgmr.msrb.gmra.mxu3 %vm449_vm1, %v664_v31 }
 0x2bc   : > { %v740_v36 = vsel %vm739_vm15, %v1195_v9, %v736_v32 }
 0x2bd   : > { %v745_v38 = vsel %vm742_vm3, %v744_v33, %v740_v36  ;;  %1056 = vst.msk [vmem:[%s1644_s20 + $0x8] sm:$0xf] %vm502_vm9, %v665_v35  ;;  %v576_v39 = vsel %vm575_vm4, %v1197_v12, %v572_v34 }
 0x2be   : > { %v581_v40 = vsel %vm578_vm5, %v580_v37, %v576_v39  ;;  %v746_v41 = vmul.f32 %v1619_v50, %v745_v38 }
 0x2bf   : > { %v587_v42 = vpop.permute.xlu1 %586  ;;  %v582_v43 = vmul.f32 %v1621_v51, %v581_v40  ;;  %v797_v51 = vld [vmem:[#allocation8 + $0x18] sm:$0xff] }
 0x2c0   : > { %607 = vmatpush.msrb.mxu2 %v587_v42  ;;  %v751_v44 = vpop.permute.xlu0 %750  ;;  %v747_v45 = vpack.c.bf16 %v746_v41, %v746_v41  ;;  %813 = vmatpush.msra.mxu1 %v797_v51 }
 0x2c1   : > { %v583_v46 = vpack.c.bf16 %v582_v43, %v582_v43  ;;  %1053 = vmatmul.msk.f32.vlgmr.msrb.gmra.mxu2 %vm449_vm1, %v582_v43 }
 0x2c2   : > { %771 = vmatpush.msra.mxu2 %v751_v44  ;;  %1060 = vst.msk [vmem:[%s1644_s20 + $0xc] sm:$0xf] %vm502_vm9, %v747_v45  ;;  %814 = vmatpush.msra.mxu1 %v796_v52 }
 0x2c3   : > { %1052 = vst.msk [vmem:[%s1644_s20 + $0x4] sm:$0xf] %vm502_vm9, %v583_v46 }
 0x2c4   : > { %815 = vmatpush.msra.mxu1 %v795_v53 }
 0x2c6   : > { %816 = vmatpush.msra.mxu1 %v794_v54 }
 0x2c9   : > { %1061 = vmatmul.msk.f32.vlgmr.msra.gmra.mxu2 %vm449_vm1, %v746_v41 }
 0x336   : > { %v527_v47 = vpop.f32.mrf.mxu2 }
 0x33e   : > { %v691_v48 = vpop.f32.mrf.mxu3 }
 0x33f   : > { %781 = vrot.lane.b32.xlu0 %v691_v48, %s1425_s21  ;;  %s1302_s21 = sshra.s32 %s870_s16, 4  ;;  %s1303_s21 = int_to_ptr.hbm [resolvable:$true] %s1302_s21 }
 0x340   : > { %p1309_p10 = scmp.lt.s32.totalorder %s1303_s21, %s1734_s7 }
 0x344   : > { %v609_v49 = vpop.f32.mrf.mxu2 }
 0x345   : > { %777 = vrot.lane.b32.xlu1 %v609_v49, %s1426_s10  ;;  %s1304_s10 = scalar_lea.hbm %s1303_s21, 16 }
 0x346   : > { %p1305_p3 = scmp.ne.s32.totalorder %s1303_s21, %s1304_s10  ;;  %p1310_p12 = scmp.lt.s32.totalorder %s1308_s12, %s1304_s10 }
 0x348   : > { %p1306_p8 = pnand %p1305_p3, %p1543_p0  ;;  %p1311_p13 = por %p1310_p12, %p1309_p10 }
 0x34a   : > { %p1307_p9 = pneg %p1306_p8 }
 0x34c   : > { %v773_v50 = vpop.f32.mrf.mxu2  ;;  %p1312_p2 = pnand %p1311_p13, %p1307_p9 }
 0x34d   : > { %785 = vrot.lane.b32.xlu2 %v773_v50, %s1427_s23 }
 0x3a7   : > { %v786_v58 = vpop.permute.xlu2 %785 }
 0x3b1   : > { %v782_v56 = vpop.permute.xlu0 %781 }
 0x3b7   : > { %v778_v55 = vpop.permute.xlu1 %777 }
 0x3b8   : > { %v788_v57 = vsel %vm449_vm1, %v527_v47, %v778_v55 }
 0x3b9   : > { %v790_v59 = vsel %vm789_vm6, %v788_v57, %v782_v56 }
 0x3ba   : > { %v792_v60 = vsel %vm791_vm7, %v790_v59, %v786_v58 }
 0x3bb   : > { %1062 = vmatmul.msk.f32.vlgmr.msra.gmra.mxu1 %vm403_vm0, %v792_v60 }
 0x3bc   : > { %1315 = shalt.err (!%p1312_p2)
}
 0x3bd   : > { %s1428_s30 = smov 4   ;;  %s1748_s2 = smov 64   ;;  %v793_v61 = vld [vmem:[#allocation2] sm:$0xff] }
 0x3be   : > { %1082 = dma.vmem_to_hbm [thread:$0]  (%p1543_p0), %s868_s17, 256, %s870_s16, %s839_s19, %s1748_s2, %s1748_s2, %s1428_s30  }
 0x3bf   : > { %s1065_s18 = sshll.u32 %s1398_s27, 3  ;;  %v1181_v0 = vld [vmem:[%s1732_s5] ss:$0 sm:$0xff]  ;;  %s1749_s10 = sshll.u32 %s1563_s9, 3 }
 0x3c0   : > { %s849_s8 = scalar_lea.hbm %s1733_s6, %s1065_s18  ;;  %s384_s23 = scalar_lea.vmem [#allocation9], %s1749_s10 }
 0x3c1   : > { %s851_s20 = sshll.u32 %s384_s23, 4  ;;  %s853_s17 = sshll.u32 %s849_s8, 4  ;;  %s852_s20 = int_to_ptr.vmem [resolvable:$true] %s851_s20  ;;  %s854_s17 = int_to_ptr.hbm [resolvable:$true] %s853_s17 }
 0x3c2   : > { %s834_s27 = scalar_lea.sflag [#allocation5], %s1563_s9  ;;  %s1330_s16 = sshra.s32 %s854_s17, 4  ;;  %s1331_s16 = int_to_ptr.hbm [resolvable:$true] %s1330_s16 }
 0x3c3   : > { %s1332_s19 = scalar_lea.hbm %s1331_s16, 8  ;;  %s1336_s18 = scalar_lea.hbm %s1733_s6, 16 }
 0x3c4   : > { %p1333_p4 = scmp.ne.s32.totalorder %s1331_s16, %s1332_s19  ;;  %p1337_p1 = scmp.lt.s32.totalorder %s1331_s16, %s1733_s6 }
 0x3c5   : > { %p1338_p3 = scmp.lt.s32.totalorder %s1336_s18, %s1332_s19 }
 0x3c6   : > { %p1334_p7 = pnand %p1333_p4, %p1543_p0 }
 0x3c7   : > { %p1339_p8 = por %p1338_p3, %p1337_p1 }
 0x3c8   : > { %p1335_p11 = pneg %p1334_p7 }
 0x3ca   : > { %p1340_p9 = pnand %p1339_p8, %p1335_p11 }
 0x438   : > { %v818_v62 = vpop.f32.mrf.mxu1 }
 0x439   : > { %v821_v63 = vadd.f32 %v818_v62, %v793_v61 }
 0x43b   : > { %822 = vst.msk [vmem:[#allocation2] sm:$0xff] %vm403_vm0, %v821_v63 }
 0x442   : > { %v826_v1 = vld [vmem:[#allocation2] sm:$0xff] }
 0x443   : > { %v831_v2 = vadd.f32 %v1181_v0, %v826_v1 }
 0x445   : > { %832 = vst.msk [vmem:[%s384_s23] sm:$0xff] %vm403_vm0, %v831_v2 }
 0x446   : > { %1343 = shalt.err (!%p1340_p9)
}
 0x447   : > { %1081 = dma.vmem_to_hbm [thread:$0]  (%p1543_p0), %s852_s20, 128, %s854_s17, %s834_s27  }
 0x448 PF: > { %s884_s9 = sand.u32 1, %s1386_s24   ;;  %p1097_p10 = pnand %p1037_p6, %p1550_p5 }
 0x449   : > { %s885_s8 = scalar_lea.sflag [#allocation5], %s884_s9 }
 0x44a   : > { %p1098_p12 = pneg %p1097_p10 }
 0x44c   : > { %1377 = dma.done.wait (%p1098_p12), %s885_s8, 128  }
 0x44d   : > { %1379 = vsyncadd (%p1098_p12), %s885_s8, 4294967168  ;;  %s895_s11 = scalar_lea.sflag [#allocation11], %s884_s9 }
 0x44e   : > { %1381 = dma.done.wait (%p1098_p12), %s895_s11, 256  }
 0x44f   : > { %1383 = vsyncadd (%p1098_p12), %s895_s11, 4294967040  ;;  %s28_s29 = sadd.s32 1, %s1406_s29   ;;  %s1750_s24 = smov %s1390_s25 }
 0x450   : > { %p25_p13 = scmp.ge.s32.totalorder %s28_s29, 4   ;;  %s1751_s25 = smov %s1394_s26 }
 0x451   : > { %s1752_s26 = smov %s1548_s14  ;;  %s1753_s27 = smov %s1402_s28 }
 0x452   : > { %s1754_s28 = smov %s1756_s22  ;;  %27 = sbr.rel (!%p25_p13) target bundleno = 12 (0xc), region = 133 }
 0x457   :  { %901 = vsyncpa [#allocation4], 1 }
 0x458   :  { %903 = vsyncpa [#allocation4 + $0x1], 1 }
 0x459   :  { %904 = vsyncpa [#allocation7], 1 }
 0x45a   :  { %905 = vsyncpa [#allocation5], 1 }
 0x45b   :  { %907 = vsyncpa [#allocation5 + $0x1], 1 }
 0x45c   :  { %908 = vsyncpa [#allocation11], 1 }
 0x45d   :  { %910 = vsyncpa [#allocation11 + $0x1], 1 }

</bundles_post_ra>
